<compile_context>
chip_gen: v5e
topology: v5e:2x2
jax: 0.10.0
libtpu: 0.0.40
codegen_flags: <defaults>
</compile_context>

<pallas_src>
import jax
import jax.numpy as jnp
from jax.experimental import pallas as pl
from jax.experimental.pallas import tpu as pltpu

_LN_EPS = 1e-6
_VMEM_LIMIT = 32 * 1024 * 1024  # safe on v5e/v6e/v7x (scoped defaults 16/32/32 MiB)


def _round_up(a, b):
    return (a + b - 1) // b * b


def _row_tile(rows, cap=512):
    """Row tile: multiple of 8 sublanes, <= cap, >=2 grid steps when possible
    so both TensorCores on v7x get work."""
    t = min(cap, _round_up(pl.cdiv(rows, 2), 8))
    return max(t, 8)


# ----------------------------- patch embedding ------------------------------

def _patch_embed_kernel(p_ref, w_ref, b_ref, o_ref):
    # p_ref: (TM, Kf) folded patch rows; w_ref: (Kf, Of) block-diagonal weight;
    # b_ref: (1, Of); o_ref: (TM, Of).  f32 accumulation on the MXU.
    acc = jnp.dot(p_ref[...], w_ref[...], preferred_element_type=jnp.float32)
    acc = acc + b_ref[...].astype(jnp.float32)
    o_ref[...] = acc.astype(o_ref.dtype)


def pack_patch_embed_params(weight, bias):
    """Pack torch-layout Conv2d(k=2, s=2) params once, outside the hot path.

    weight: (dim_out, C_in, 2, 2), bias: (dim_out,).
    Returns a block-diagonal (fold*K, fold*dim_out) weight and a tiled
    (1, fold*dim_out) bias, with fold = 128 // dim_out when dim_out divides 128
    (=> lane-dense 128-wide output rows), else fold = 1.
    """
    dim_out, c_in, kh, kw = weight.shape
    k = c_in * kh * kw
    fold = 128 // dim_out if (dim_out < 128 and 128 % dim_out == 0) else 1
    w2d = weight.reshape(dim_out, k).T                         # (K, dim_out) — tiny, one-off
    w_fold = jnp.kron(jnp.eye(fold, dtype=w2d.dtype), w2d)     # (fold*K, fold*dim_out)
    b_fold = jnp.tile(bias.reshape(1, dim_out), (1, fold))     # (1, fold*dim_out)
    return w_fold, b_fold


def patch_embed_forward(x, w_fold, b_fold):
    """DownLayer forward: (B, C_in, H, W) -> ((B, N, dim_out), H//2, W//2)."""
    b, c_in, h, w = x.shape
    ho, wo = h // 2, w // 2
    n = ho * wo
    k = c_in * 4
    kf, of = w_fold.shape
    fold = kf // k
    dim_out = of // fold
    m = b * n

    # Non-overlapping 2x2 patches in (c, kh, kw) order (matches torch
    # weight.reshape(dim_out, -1)).  Kept in the input dtype (no f32 upcast);
    # allow_input_fusion lets XLA fuse this transpose into the kernel's input
    # DMA rather than doing a separate HBM round-trip.
    patches = x.reshape(b, c_in, ho, 2, wo, 2)
    patches = patches.transpose(0, 2, 4, 1, 3, 5).reshape(m, k)

    mf = pl.cdiv(m, fold)
    tm = _row_tile(mf)
    mf_pad = _round_up(mf, tm)
    rows_pad = mf_pad * fold
    if rows_pad != m:
        patches = jnp.pad(patches, ((0, rows_pad - m), (0, 0)))
    # Free reshape: row-major (rows_pad, K) == (rows_pad/fold, fold*K).
    patches_f = patches.reshape(mf_pad, kf)

    itemsize = jnp.dtype(x.dtype).itemsize
    out = pl.pallas_call(
        _patch_embed_kernel,
        out_shape=jax.ShapeDtypeStruct((mf_pad, of), x.dtype),
        grid=(mf_pad // tm,),
        in_specs=[
            pl.BlockSpec((tm, kf), lambda i: (i, 0)),
            pl.BlockSpec((kf, of), lambda i: (0, 0)),
            pl.BlockSpec((1, of), lambda i: (0, 0)),
        ],
        out_specs=pl.BlockSpec((tm, of), lambda i: (i, 0)),
        compiler_params=pltpu.CompilerParams(
            dimension_semantics=("parallel",),
            vmem_limit_bytes=_VMEM_LIMIT,
            allow_input_fusion=[True, False, False],
        ),
        cost_estimate=pl.CostEstimate(
            flops=2 * mf_pad * kf * of,
            transcendentals=0,
            bytes_accessed=(mf_pad * kf + kf * of + of + mf_pad * of) * itemsize,
        ),
    )(patches_f, w_fold, b_fold)

    # Un-fold: row-major (mf_pad, fold*dim_out) == (mf_pad*fold, dim_out); free.
    out = out.reshape(mf_pad * fold, dim_out)[:m].reshape(b, n, dim_out)
    return out, ho, wo


# ------------------------ LayerNorm / layer-scale kernels -------------------

def _layernorm_kernel(x_ref, w_ref, b_ref, o_ref):
    x = x_ref[...].astype(jnp.float32)
    mean = jnp.mean(x, axis=-1, keepdims=True)
    xc = x - mean
    var = jnp.mean(xc * xc, axis=-1, keepdims=True)
    y = xc * jax.lax.rsqrt(var + _LN_EPS)
    y = y * w_ref[...].astype(jnp.float32) + b_ref[...].astype(jnp.float32)
    o_ref[...] = y.astype(o_ref.dtype)


def _ln_scale_residual_kernel(y_ref, r_ref, w_ref, b_ref, g_ref, o_ref):
    # o = r + gamma * LayerNorm(y)   (BlockLayerScale residual + layer scale)
    y = y_ref[...].astype(jnp.float32)
    mean = jnp.mean(y, axis=-1, keepdims=True)
    yc = y - mean
    var = jnp.mean(yc * yc, axis=-1, keepdims=True)
    nrm = yc * jax.lax.rsqrt(var + _LN_EPS)
    nrm = nrm * w_ref[...].astype(jnp.float32) + b_ref[...].astype(jnp.float32)
    o_ref[...] = (r_ref[...].astype(jnp.float32)
                  + g_ref[...].astype(jnp.float32) * nrm).astype(o_ref.dtype)


def _run_rowwise(kernel, row_arrays, chan_params, out_dtype):
    """Tile a row-wise kernel over (R, C) arrays; chan_params are (1, C)."""
    r, c = row_arrays[0].shape
    tr = _row_tile(r)
    r_pad = _round_up(r, tr)
    if r_pad != r:
        row_arrays = [jnp.pad(a, ((0, r_pad - r), (0, 0))) for a in row_arrays]
    row_spec = pl.BlockSpec((tr, c), lambda i: (i, 0))
    par_spec = pl.BlockSpec((1, c), lambda i: (0, 0))
    out = pl.pallas_call(
        kernel,
        out_shape=jax.ShapeDtypeStruct((r_pad, c), out_dtype),
        grid=(r_pad // tr,),
        in_specs=[row_spec] * len(row_arrays) + [par_spec] * len(chan_params),
        out_specs=row_spec,
        compiler_params=pltpu.CompilerParams(
            dimension_semantics=("parallel",),
            vmem_limit_bytes=_VMEM_LIMIT,
        ),
    )(*row_arrays, *chan_params)
    return out[:r]


def layernorm(x2d, w, b):
    c = x2d.shape[-1]
    return _run_rowwise(_layernorm_kernel, [x2d],
                        [w.reshape(1, c), b.reshape(1, c)], x2d.dtype)


def ln_scale_residual(y2d, res2d, w, b, gamma):
    c = y2d.shape[-1]
    return _run_rowwise(_ln_scale_residual_kernel, [y2d, res2d],
                        [w.reshape(1, c), b.reshape(1, c), gamma.reshape(1, c)],
                        res2d.dtype)


# ------------------------------ GlobalFilter --------------------------------

def global_filter(x_bnc, complex_weight, size):
    # TODO(synk): rfft2/irfft2 have no Pallas TPU equivalent; FFT + complex
    # multiply run in jnp (XLA TPU FFT), matching torch.fft.* with norm='ortho'.
    b, n, c = x_bnc.shape
    x = x_bnc.reshape(b, size, size, c).astype(jnp.float32)
    xf = jnp.fft.rfft2(x, axes=(1, 2), norm="ortho")
    d = xf.shape[2]
    wc = complex_weight[:, :d, :, 0] + 1j * complex_weight[:, :d, :, 1]
    xf = xf * wc
    x = jnp.fft.irfft2(xf, s=(size, size), axes=(1, 2), norm="ortho")
    return x.reshape(b, n, c)


# -------------------------------- Down.forward ------------------------------

def down_forward(x, params):
    """Down.forward: x (B, C_in, H, W) -> (B, dim_out, H//2, W//2)."""
    b = x.shape[0]
    # pos_drop is Dropout(p=drop_rate); drop_rate defaults to 0 -> identity.
    tokens, ho, wo = patch_embed_forward(x, params["w_fold"], params["b_fold"])
    assert ho == wo, "GlobalFilter assumes a square token grid"
    n, c = ho * wo, tokens.shape[-1]
    t = tokens.reshape(b * n, c)
    for blk in params["blocks"]:
        # BlockLayerScale: x = x + drop_path(gamma * LN2(GlobalFilter(LN1(x))));
        # drop_path = Identity (drop_path_rate = 0); the Mlp member is unused.
        y = layernorm(t, blk["ln1_w"], blk["ln1_b"])
        y = global_filter(y.reshape(b, n, c), blk["complex_weight"], ho)
        t = ln_scale_residual(y.reshape(b * n, c), t,
                              blk["ln2_w"], blk["ln2_b"], blk["gamma"])
    t = layernorm(t, params["norm_w"], params["norm_b"])
    return t.reshape(b, ho, wo, c).transpose(0, 3, 1, 2)


# ------------------------------ pure-JAX reference --------------------------

def _reference_down(x, weight, bias, blocks, norm_w, norm_b):
    def ln(v, w_, b_):
        m = jnp.mean(v, axis=-1, keepdims=True)
        var = jnp.mean((v - m) ** 2, axis=-1, keepdims=True)
        return (v - m) / jnp.sqrt(var + _LN_EPS) * w_ + b_

    y = jax.lax.conv_general_dilated(
        x.astype(jnp.float32), weight.astype(jnp.float32),
        window_strides=(2, 2), padding="VALID",
        dimension_numbers=("NCHW", "OIHW", "NCHW"))
    y = y + bias.reshape(1, -1, 1, 1)
    b, c, ho, wo = y.shape
    t = jnp.transpose(y.reshape(b, c, ho * wo), (0, 2, 1))  # (B, N, C)
    for blk in blocks:
        y1 = ln(t, blk["ln1_w"], blk["ln1_b"])
        z = global_filter(y1, blk["complex_weight"], ho)
        t = t + blk["gamma"] * ln(z, blk["ln2_w"], blk["ln2_b"])
    t = ln(t, norm_w, norm_b)
    return jnp.transpose(t.reshape(b, ho, wo, c), (0, 3, 1, 2))


if __name__ == "__main__":
    # Down(in_chns=4, out_chns=32, depth=2, size=8): input spatial is 2*size = 16.
    B, C_IN, C_OUT, DEPTH, S = 2, 4, 32, 2, 8
    H = W = 2 * S

    key = jax.random.PRNGKey(0)
    ks = jax.random.split(key, 8)
    x = jax.random.normal(ks[0], (B, C_IN, H, W), jnp.float32)

    # Conv2d(k=2, s=2) params at torch's default-uniform scale.
    fan_in = C_IN * 4
    bound = 1.0 / fan_in ** 0.5
    weight = jax.random.uniform(ks[1], (C_OUT, C_IN, 2, 2), jnp.float32, -bound, bound)
    bias = jax.random.uniform(ks[2], (C_OUT,), jnp.float32, -bound, bound)

    blocks = []
    for d in range(DEPTH):
        kb = jax.random.split(ks[3 + d], 6)
        blocks.append(dict(
            ln1_w=1.0 + 0.1 * jax.random.normal(kb[0], (C_OUT,), jnp.float32),
            ln1_b=0.1 * jax.random.normal(kb[1], (C_OUT,), jnp.float32),
            complex_weight=0.02 * jax.random.normal(kb[2], (S, S, C_OUT, 2), jnp.float32),
            ln2_w=1.0 + 0.1 * jax.random.normal(kb[3], (C_OUT,), jnp.float32),
            ln2_b=0.1 * jax.random.normal(kb[4], (C_OUT,), jnp.float32),
            # layer-scale gamma (init_values * ones in torch; randomized here to
            # exercise the fused kernel with non-trivial values).
            gamma=0.1 + 0.05 * jax.random.normal(kb[5], (C_OUT,), jnp.float32),
        ))
    norm_w = 1.0 + 0.1 * jax.random.normal(ks[5], (C_OUT,), jnp.float32)
    norm_b = 0.1 * jax.random.normal(ks[6], (C_OUT,), jnp.float32)

    # One-off param packing (kept outside the jitted hot path).
    w_fold, b_fold = pack_patch_embed_params(weight, bias)
    params = dict(w_fold=w_fold, b_fold=b_fold, blocks=blocks,
                  norm_w=norm_w, norm_b=norm_b)

    out = jax.jit(down_forward)(x, params)
    out = jax.block_until_ready(out)
    assert out.shape == (B, C_OUT, S, S)

    ref = jax.block_until_ready(_reference_down(x, weight, bias, blocks, norm_w, norm_b))
    err = float(jnp.max(jnp.abs(out - ref)))
    assert err < 5e-3, f"full Down forward mismatch: max abs err = {err}"

    # bf16 fast path for the patch-embed kernel (native dtype in, f32 accumulate).
    w_fold16, b_fold16 = pack_patch_embed_params(weight.astype(jnp.bfloat16),
                                                 bias.astype(jnp.bfloat16))
    emb16, _, _ = patch_embed_forward(x.astype(jnp.bfloat16), w_fold16, b_fold16)
    emb16 = jax.block_until_ready(emb16)
    conv = jax.lax.conv_general_dilated(
        x, weight, window_strides=(2, 2), padding="VALID",
        dimension_numbers=("NCHW", "OIHW", "NCHW")) + bias.reshape(1, -1, 1, 1)
    emb_ref = jnp.transpose(conv.reshape(B, C_OUT, S * S), (0, 2, 1))
    err16 = float(jnp.max(jnp.abs(emb16.astype(jnp.float32) - emb_ref)))
    assert emb16.dtype == jnp.bfloat16 and err16 < 0.1, f"bf16 patch embed err = {err16}"

    print("KERNEL_OK")
</pallas_src>

<mosaic_0001>
module attributes {stable_mosaic.version = 11 : i64} {
  func.func @_patch_embed_kernel(%arg0: i32, %arg1: memref<16x64xf32, #tpu.memory_space<vmem>>, %arg2: memref<64x128xf32, #tpu.memory_space<vmem>>, %arg3: memref<1x128xf32, #tpu.memory_space<vmem>>, %arg4: memref<16x128xf32, #tpu.memory_space<vmem>>) attributes {dimension_semantics = [#tpu.dimension_semantics<parallel>], iteration_bounds = array<i64: 2>, scalar_prefetch = 0 : i64, scratch_operands = 0 : i64, tpu.core_type = #tpu.core_type<tc>, window_params = [{transform_indices = @transform_0, window_bounds = array<i64: 16, 64>}, {pipeline_mode = #tpu.pipeline_mode<synchronous>, transform_indices = @transform_1, window_bounds = array<i64: 64, 128>}, {pipeline_mode = #tpu.pipeline_mode<synchronous>, transform_indices = @transform_2, window_bounds = array<i64: 1, 128>}, {transform_indices = @transform_3, window_bounds = array<i64: 16, 128>}]} {
    %c0 = arith.constant 0 : index
    %c0_0 = arith.constant 0 : index
    %0 = vector.load %arg1[%c0, %c0_0] : memref<16x64xf32, #tpu.memory_space<vmem>>, vector<16x64xf32>
    %c0_1 = arith.constant 0 : index
    %c0_2 = arith.constant 0 : index
    %1 = vector.load %arg2[%c0_1, %c0_2] : memref<64x128xf32, #tpu.memory_space<vmem>>, vector<64x128xf32>
    %cst = arith.constant dense<0.000000e+00> : vector<16x128xf32>
    %2 = tpu.matmul %0, %1, %cst {dimension_numbers = #tpu.dot_dimension_numbers<[1], [0], [0], [1], [0, 0, 1, 1], [], []>} : vector<16x64xf32>, vector<64x128xf32>, vector<16x128xf32> -> vector<16x128xf32>
    %c0_3 = arith.constant 0 : index
    %c0_4 = arith.constant 0 : index
    %3 = vector.load %arg3[%c0_3, %c0_4] : memref<1x128xf32, #tpu.memory_space<vmem>>, vector<1x128xf32>
    %4 = vector.broadcast %3 : vector<1x128xf32> to vector<16x128xf32>
    %5 = arith.addf %2, %4 : vector<16x128xf32>
    %c0_5 = arith.constant 0 : index
    %c0_6 = arith.constant 0 : index
    %6 = vector.load %arg4[%c0_5, %c0_6] : memref<16x128xf32, #tpu.memory_space<vmem>>, vector<16x128xf32>
    tpu.vector_store %arg4[%c0_5, %c0_6], %5 {strides = array<i32>} : memref<16x128xf32, #tpu.memory_space<vmem>>, vector<16x128xf32>,
    return
  }
  func.func @transform_0(%arg0: i32) -> (i32, i32) {
    %c0_i32 = arith.constant 0 : i32
    %c0_i32_0 = arith.constant 0 : i32
    return %arg0, %c0_i32 : i32, i32
  }
  func.func @transform_1(%arg0: i32) -> (i32, i32) {
    %c0_i32 = arith.constant 0 : i32
    %c0_i32_0 = arith.constant 0 : i32
    %c0_i32_1 = arith.constant 0 : i32
    return %c0_i32, %c0_i32_0 : i32, i32
  }
  func.func @transform_2(%arg0: i32) -> (i32, i32) {
    %c0_i32 = arith.constant 0 : i32
    %c0_i32_0 = arith.constant 0 : i32
    %c0_i32_1 = arith.constant 0 : i32
    return %c0_i32, %c0_i32_0 : i32, i32
  }
  func.func @transform_3(%arg0: i32) -> (i32, i32) {
    %c0_i32 = arith.constant 0 : i32
    %c0_i32_0 = arith.constant 0 : i32
    return %arg0, %c0_i32 : i32, i32
  }
}

module attributes {stable_mosaic.version = 11 : i64} {
  func.func @_layernorm_kernel(%arg0: i32, %arg1: memref<64x32xf32, #tpu.memory_space<vmem>>, %arg2: memref<1x32xf32, #tpu.memory_space<vmem>>, %arg3: memref<1x32xf32, #tpu.memory_space<vmem>>, %arg4: memref<64x32xf32, #tpu.memory_space<vmem>>) attributes {dimension_semantics = [#tpu.dimension_semantics<parallel>], iteration_bounds = array<i64: 2>, scalar_prefetch = 0 : i64, scratch_operands = 0 : i64, tpu.core_type = #tpu.core_type<tc>, window_params = [{transform_indices = @transform_0, window_bounds = array<i64: 64, 32>}, {pipeline_mode = #tpu.pipeline_mode<synchronous>, transform_indices = @transform_1, window_bounds = array<i64: 1, 32>}, {pipeline_mode = #tpu.pipeline_mode<synchronous>, transform_indices = @transform_2, window_bounds = array<i64: 1, 32>}, {transform_indices = @transform_3, window_bounds = array<i64: 64, 32>}]} {
    %c0 = arith.constant 0 : index
    %c0_0 = arith.constant 0 : index
    %0 = vector.load %arg1[%c0, %c0_0] : memref<64x32xf32, #tpu.memory_space<vmem>>, vector<64x32xf32>
    %cst = arith.constant dense<0.000000e+00> : vector<64xf32>
    %1 = vector.multi_reduction <add>, %0, %cst [1] : vector<64x32xf32> to vector<64xf32>
    %2 = vector.shape_cast %1 : vector<64xf32> to vector<64x1xf32>
    %cst_1 = arith.constant 3.200000e+01 : f32
    %3 = vector.broadcast %cst_1 : f32 to vector<64x1xf32>
    %4 = arith.divf %2, %3 : vector<64x1xf32>
    %5 = vector.broadcast %4 : vector<64x1xf32> to vector<64x32xf32>
    %6 = arith.subf %0, %5 : vector<64x32xf32>
    %7 = arith.mulf %6, %6 : vector<64x32xf32>
    %cst_2 = arith.constant dense<0.000000e+00> : vector<64xf32>
    %8 = vector.multi_reduction <add>, %7, %cst_2 [1] : vector<64x32xf32> to vector<64xf32>
    %9 = vector.shape_cast %8 : vector<64xf32> to vector<64x1xf32>
    %cst_3 = arith.constant 3.200000e+01 : f32
    %10 = vector.broadcast %cst_3 : f32 to vector<64x1xf32>
    %11 = arith.divf %9, %10 : vector<64x1xf32>
    %cst_4 = arith.constant 9.99999997E-7 : f32
    %12 = vector.broadcast %cst_4 : f32 to vector<64x1xf32>
    %13 = arith.addf %11, %12 : vector<64x1xf32>
    %14 = math.rsqrt %13 : vector<64x1xf32>
    %15 = vector.broadcast %14 : vector<64x1xf32> to vector<64x32xf32>
    %16 = arith.mulf %6, %15 : vector<64x32xf32>
    %c0_5 = arith.constant 0 : index
    %c0_6 = arith.constant 0 : index
    %17 = vector.load %arg2[%c0_5, %c0_6] : memref<1x32xf32, #tpu.memory_space<vmem>>, vector<1x32xf32>
    %18 = vector.broadcast %17 : vector<1x32xf32> to vector<64x32xf32>
    %19 = arith.mulf %16, %18 : vector<64x32xf32>
    %c0_7 = arith.constant 0 : index
    %c0_8 = arith.constant 0 : index
    %20 = vector.load %arg3[%c0_7, %c0_8] : memref<1x32xf32, #tpu.memory_space<vmem>>, vector<1x32xf32>
    %21 = vector.broadcast %20 : vector<1x32xf32> to vector<64x32xf32>
    %22 = arith.addf %19, %21 : vector<64x32xf32>
    %c0_9 = arith.constant 0 : index
    %c0_10 = arith.constant 0 : index
    %23 = vector.load %arg4[%c0_9, %c0_10] : memref<64x32xf32, #tpu.memory_space<vmem>>, vector<64x32xf32>
    tpu.vector_store %arg4[%c0_9, %c0_10], %22 {strides = array<i32>} : memref<64x32xf32, #tpu.memory_space<vmem>>, vector<64x32xf32>,
    return
  }
  func.func @transform_0(%arg0: i32) -> (i32, i32) {
    %c0_i32 = arith.constant 0 : i32
    %c0_i32_0 = arith.constant 0 : i32
    return %arg0, %c0_i32 : i32, i32
  }
  func.func @transform_1(%arg0: i32) -> (i32, i32) {
    %c0_i32 = arith.constant 0 : i32
    %c0_i32_0 = arith.constant 0 : i32
    %c0_i32_1 = arith.constant 0 : i32
    return %c0_i32, %c0_i32_0 : i32, i32
  }
  func.func @transform_2(%arg0: i32) -> (i32, i32) {
    %c0_i32 = arith.constant 0 : i32
    %c0_i32_0 = arith.constant 0 : i32
    %c0_i32_1 = arith.constant 0 : i32
    return %c0_i32, %c0_i32_0 : i32, i32
  }
  func.func @transform_3(%arg0: i32) -> (i32, i32) {
    %c0_i32 = arith.constant 0 : i32
    %c0_i32_0 = arith.constant 0 : i32
    return %arg0, %c0_i32 : i32, i32
  }
}

module attributes {stable_mosaic.version = 11 : i64} {
  func.func @_ln_scale_residual_kernel(%arg0: i32, %arg1: memref<64x32xf32, #tpu.memory_space<vmem>>, %arg2: memref<64x32xf32, #tpu.memory_space<vmem>>, %arg3: memref<1x32xf32, #tpu.memory_space<vmem>>, %arg4: memref<1x32xf32, #tpu.memory_space<vmem>>, %arg5: memref<1x32xf32, #tpu.memory_space<vmem>>, %arg6: memref<64x32xf32, #tpu.memory_space<vmem>>) attributes {dimension_semantics = [#tpu.dimension_semantics<parallel>], iteration_bounds = array<i64: 2>, scalar_prefetch = 0 : i64, scratch_operands = 0 : i64, tpu.core_type = #tpu.core_type<tc>, window_params = [{transform_indices = @transform_0, window_bounds = array<i64: 64, 32>}, {transform_indices = @transform_1, window_bounds = array<i64: 64, 32>}, {pipeline_mode = #tpu.pipeline_mode<synchronous>, transform_indices = @transform_2, window_bounds = array<i64: 1, 32>}, {pipeline_mode = #tpu.pipeline_mode<synchronous>, transform_indices = @transform_3, window_bounds = array<i64: 1, 32>}, {pipeline_mode = #tpu.pipeline_mode<synchronous>, transform_indices = @transform_4, window_bounds = array<i64: 1, 32>}, {transform_indices = @transform_5, window_bounds = array<i64: 64, 32>}]} {
    %c0 = arith.constant 0 : index
    %c0_0 = arith.constant 0 : index
    %0 = vector.load %arg1[%c0, %c0_0] : memref<64x32xf32, #tpu.memory_space<vmem>>, vector<64x32xf32>
    %cst = arith.constant dense<0.000000e+00> : vector<64xf32>
    %1 = vector.multi_reduction <add>, %0, %cst [1] : vector<64x32xf32> to vector<64xf32>
    %2 = vector.shape_cast %1 : vector<64xf32> to vector<64x1xf32>
    %cst_1 = arith.constant 3.200000e+01 : f32
    %3 = vector.broadcast %cst_1 : f32 to vector<64x1xf32>
    %4 = arith.divf %2, %3 : vector<64x1xf32>
    %5 = vector.broadcast %4 : vector<64x1xf32> to vector<64x32xf32>
    %6 = arith.subf %0, %5 : vector<64x32xf32>
    %7 = arith.mulf %6, %6 : vector<64x32xf32>
    %cst_2 = arith.constant dense<0.000000e+00> : vector<64xf32>
    %8 = vector.multi_reduction <add>, %7, %cst_2 [1] : vector<64x32xf32> to vector<64xf32>
    %9 = vector.shape_cast %8 : vector<64xf32> to vector<64x1xf32>
    %cst_3 = arith.constant 3.200000e+01 : f32
    %10 = vector.broadcast %cst_3 : f32 to vector<64x1xf32>
    %11 = arith.divf %9, %10 : vector<64x1xf32>
    %cst_4 = arith.constant 9.99999997E-7 : f32
    %12 = vector.broadcast %cst_4 : f32 to vector<64x1xf32>
    %13 = arith.addf %11, %12 : vector<64x1xf32>
    %14 = math.rsqrt %13 : vector<64x1xf32>
    %15 = vector.broadcast %14 : vector<64x1xf32> to vector<64x32xf32>
    %16 = arith.mulf %6, %15 : vector<64x32xf32>
    %c0_5 = arith.constant 0 : index
    %c0_6 = arith.constant 0 : index
    %17 = vector.load %arg3[%c0_5, %c0_6] : memref<1x32xf32, #tpu.memory_space<vmem>>, vector<1x32xf32>
    %18 = vector.broadcast %17 : vector<1x32xf32> to vector<64x32xf32>
    %19 = arith.mulf %16, %18 : vector<64x32xf32>
    %c0_7 = arith.constant 0 : index
    %c0_8 = arith.constant 0 : index
    %20 = vector.load %arg4[%c0_7, %c0_8] : memref<1x32xf32, #tpu.memory_space<vmem>>, vector<1x32xf32>
    %21 = vector.broadcast %20 : vector<1x32xf32> to vector<64x32xf32>
    %22 = arith.addf %19, %21 : vector<64x32xf32>
    %c0_9 = arith.constant 0 : index
    %c0_10 = arith.constant 0 : index
    %23 = vector.load %arg2[%c0_9, %c0_10] : memref<64x32xf32, #tpu.memory_space<vmem>>, vector<64x32xf32>
    %c0_11 = arith.constant 0 : index
    %c0_12 = arith.constant 0 : index
    %24 = vector.load %arg5[%c0_11, %c0_12] : memref<1x32xf32, #tpu.memory_space<vmem>>, vector<1x32xf32>
    %25 = vector.broadcast %24 : vector<1x32xf32> to vector<64x32xf32>
    %26 = arith.mulf %25, %22 : vector<64x32xf32>
    %27 = arith.addf %23, %26 : vector<64x32xf32>
    %c0_13 = arith.constant 0 : index
    %c0_14 = arith.constant 0 : index
    %28 = vector.load %arg6[%c0_13, %c0_14] : memref<64x32xf32, #tpu.memory_space<vmem>>, vector<64x32xf32>
    tpu.vector_store %arg6[%c0_13, %c0_14], %27 {strides = array<i32>} : memref<64x32xf32, #tpu.memory_space<vmem>>, vector<64x32xf32>,
    return
  }
  func.func @transform_0(%arg0: i32) -> (i32, i32) {
    %c0_i32 = arith.constant 0 : i32
    %c0_i32_0 = arith.constant 0 : i32
    return %arg0, %c0_i32 : i32, i32
  }
  func.func @transform_1(%arg0: i32) -> (i32, i32) {
    %c0_i32 = arith.constant 0 : i32
    %c0_i32_0 = arith.constant 0 : i32
    return %arg0, %c0_i32 : i32, i32
  }
  func.func @transform_2(%arg0: i32) -> (i32, i32) {
    %c0_i32 = arith.constant 0 : i32
    %c0_i32_0 = arith.constant 0 : i32
    %c0_i32_1 = arith.constant 0 : i32
    return %c0_i32, %c0_i32_0 : i32, i32
  }
  func.func @transform_3(%arg0: i32) -> (i32, i32) {
    %c0_i32 = arith.constant 0 : i32
    %c0_i32_0 = arith.constant 0 : i32
    %c0_i32_1 = arith.constant 0 : i32
    return %c0_i32, %c0_i32_0 : i32, i32
  }
  func.func @transform_4(%arg0: i32) -> (i32, i32) {
    %c0_i32 = arith.constant 0 : i32
    %c0_i32_0 = arith.constant 0 : i32
    %c0_i32_1 = arith.constant 0 : i32
    return %c0_i32, %c0_i32_0 : i32, i32
  }
  func.func @transform_5(%arg0: i32) -> (i32, i32) {
    %c0_i32 = arith.constant 0 : i32
    %c0_i32_0 = arith.constant 0 : i32
    return %arg0, %c0_i32 : i32, i32
  }
}

module attributes {stable_mosaic.version = 11 : i64} {
  func.func @_layernorm_kernel(%arg0: i32, %arg1: memref<64x32xf32, #tpu.memory_space<vmem>>, %arg2: memref<1x32xf32, #tpu.memory_space<vmem>>, %arg3: memref<1x32xf32, #tpu.memory_space<vmem>>, %arg4: memref<64x32xf32, #tpu.memory_space<vmem>>) attributes {dimension_semantics = [#tpu.dimension_semantics<parallel>], iteration_bounds = array<i64: 2>, scalar_prefetch = 0 : i64, scratch_operands = 0 : i64, tpu.core_type = #tpu.core_type<tc>, window_params = [{transform_indices = @transform_0, window_bounds = array<i64: 64, 32>}, {pipeline_mode = #tpu.pipeline_mode<synchronous>, transform_indices = @transform_1, window_bounds = array<i64: 1, 32>}, {pipeline_mode = #tpu.pipeline_mode<synchronous>, transform_indices = @transform_2, window_bounds = array<i64: 1, 32>}, {transform_indices = @transform_3, window_bounds = array<i64: 64, 32>}]} {
    %c0 = arith.constant 0 : index
    %c0_0 = arith.constant 0 : index
    %0 = vector.load %arg1[%c0, %c0_0] : memref<64x32xf32, #tpu.memory_space<vmem>>, vector<64x32xf32>
    %cst = arith.constant dense<0.000000e+00> : vector<64xf32>
    %1 = vector.multi_reduction <add>, %0, %cst [1] : vector<64x32xf32> to vector<64xf32>
    %2 = vector.shape_cast %1 : vector<64xf32> to vector<64x1xf32>
    %cst_1 = arith.constant 3.200000e+01 : f32
    %3 = vector.broadcast %cst_1 : f32 to vector<64x1xf32>
    %4 = arith.divf %2, %3 : vector<64x1xf32>
    %5 = vector.broadcast %4 : vector<64x1xf32> to vector<64x32xf32>
    %6 = arith.subf %0, %5 : vector<64x32xf32>
    %7 = arith.mulf %6, %6 : vector<64x32xf32>
    %cst_2 = arith.constant dense<0.000000e+00> : vector<64xf32>
    %8 = vector.multi_reduction <add>, %7, %cst_2 [1] : vector<64x32xf32> to vector<64xf32>
    %9 = vector.shape_cast %8 : vector<64xf32> to vector<64x1xf32>
    %cst_3 = arith.constant 3.200000e+01 : f32
    %10 = vector.broadcast %cst_3 : f32 to vector<64x1xf32>
    %11 = arith.divf %9, %10 : vector<64x1xf32>
    %cst_4 = arith.constant 9.99999997E-7 : f32
    %12 = vector.broadcast %cst_4 : f32 to vector<64x1xf32>
    %13 = arith.addf %11, %12 : vector<64x1xf32>
    %14 = math.rsqrt %13 : vector<64x1xf32>
    %15 = vector.broadcast %14 : vector<64x1xf32> to vector<64x32xf32>
    %16 = arith.mulf %6, %15 : vector<64x32xf32>
    %c0_5 = arith.constant 0 : index
    %c0_6 = arith.constant 0 : index
    %17 = vector.load %arg2[%c0_5, %c0_6] : memref<1x32xf32, #tpu.memory_space<vmem>>, vector<1x32xf32>
    %18 = vector.broadcast %17 : vector<1x32xf32> to vector<64x32xf32>
    %19 = arith.mulf %16, %18 : vector<64x32xf32>
    %c0_7 = arith.constant 0 : index
    %c0_8 = arith.constant 0 : index
    %20 = vector.load %arg3[%c0_7, %c0_8] : memref<1x32xf32, #tpu.memory_space<vmem>>, vector<1x32xf32>
    %21 = vector.broadcast %20 : vector<1x32xf32> to vector<64x32xf32>
    %22 = arith.addf %19, %21 : vector<64x32xf32>
    %c0_9 = arith.constant 0 : index
    %c0_10 = arith.constant 0 : index
    %23 = vector.load %arg4[%c0_9, %c0_10] : memref<64x32xf32, #tpu.memory_space<vmem>>, vector<64x32xf32>
    tpu.vector_store %arg4[%c0_9, %c0_10], %22 {strides = array<i32>} : memref<64x32xf32, #tpu.memory_space<vmem>>, vector<64x32xf32>,
    return
  }
  func.func @transform_0(%arg0: i32) -> (i32, i32) {
    %c0_i32 = arith.constant 0 : i32
    %c0_i32_0 = arith.constant 0 : i32
    return %arg0, %c0_i32 : i32, i32
  }
  func.func @transform_1(%arg0: i32) -> (i32, i32) {
    %c0_i32 = arith.constant 0 : i32
    %c0_i32_0 = arith.constant 0 : i32
    %c0_i32_1 = arith.constant 0 : i32
    return %c0_i32, %c0_i32_0 : i32, i32
  }
  func.func @transform_2(%arg0: i32) -> (i32, i32) {
    %c0_i32 = arith.constant 0 : i32
    %c0_i32_0 = arith.constant 0 : i32
    %c0_i32_1 = arith.constant 0 : i32
    return %c0_i32, %c0_i32_0 : i32, i32
  }
  func.func @transform_3(%arg0: i32) -> (i32, i32) {
    %c0_i32 = arith.constant 0 : i32
    %c0_i32_0 = arith.constant 0 : i32
    return %arg0, %c0_i32 : i32, i32
  }
}

</mosaic_0001>

<bundles_post_ra>
// kernel: down_forward.6
= control target key start
LH: loop header
LB: loop body
LE: loop exit
PB: predicated region body
PF: predicated region fallthrough
CT: control target
= control target key end

     0   :  { %s334_s12 = smov 0   ;;  %s378_s0 = inlined_call_operand.vmem [shape: f32[32,64], index: 0, kind: input, shape index: {}]   ;;  %s379_s1 = inlined_call_operand.vmem [shape: f32[64,128], index: 1, kind: input, shape index: {}]   ;;  %s380_s2 = inlined_call_operand.vmem [shape: f32[1,128], index: 2, kind: input, shape index: {}]   ;;  %s381_s3 = inlined_call_operand.vmem [shape: f32[32,128], index: 3, kind: output, shape index: {}]  }
   0x1 LB: > { %s276_s13 = sadd.s32 4294967295, %s312_s12   ;;  %p280_p0 = scmp.ge.s32.totalorder %s312_s12, 1  ;;  %s312_s12 = sphi %s334_s12, %s13_s12  }
   0x2   : > { %p138_p1 = scmp.lt.s32.totalorder %s312_s12, 3 }
   0x4   : > { %p139_p2 = pnand %p280_p0, %p138_p1 }
   0x5   : > { %s281_s18 = sshll.u32 (!%p139_p2), %s276_s13, 1 }
   0x6   : > { %142 = sbr.rel (%p139_p2) target bundleno = 157 (0x9d), region = 32  ;;  %p163_p3 = scmp.lt.s32.totalorder (!%p139_p2), %s281_s18, 3 }
   0xb   : > { %v183_v0 = vld [vmem:[%s379_s1 + $0x38] sm:$0xff]  ;;  %v182_v1 = vld [vmem:[%s379_s1 + $0x30] sm:$0xff]  ;;  %v181_v2 = vld [vmem:[%s379_s1 + $0x28] sm:$0xff]  ;;  %s383_s18 = smov (!%p163_p3, %s281_s18), 3  ;;  %vm188_vm0 = vcmask 523264  }
   0xc   : > { %203 = vmatpush.msra.mxu0 %v183_v0  ;;  %289 = vmatpush.msra.mxu1 %v183_v0  ;;  %v180_v3 = vld [vmem:[%s379_s1 + $0x20] sm:$0xff]  ;;  %v179_v4 = vld [vmem:[%s379_s1 + $0x18] sm:$0xff]  ;;  %s282_s25 = sshll.u32 %s383_s18, 3  ;;  %v178_v5 = vld [vmem:[%s379_s1 + $0x10] sm:$0xff] }
   0xd   : > { %v177_v6 = vld [vmem:[%s379_s1 + $0x8] sm:$0xff]  ;;  %s166_s5 = scalar_lea.vmem %s378_s0, %s282_s25  ;;  %v176_v7 = vld [vmem:[%s379_s1] sm:$0xff]  ;;  %s172_s13 = scalar_lea.vmem %s381_s3, %s282_s25 }
   0xe   : > { %204 = vmatpush.msra.mxu0 %v182_v1  ;;  %290 = vmatpush.msra.mxu1 %v182_v1  ;;  %v174_v8 = vld [vmem:[%s166_s5] sm:$0xff]  ;;  %v175_v9 = vld [vmem:[%s166_s5 + $0x8] sm:$0xff] }
   0xf   : > { %v305_v10 = vld [vmem:[%s380_s2] ss:$0 sm:$0xff] }
  0x10   : > { %205 = vmatpush.msra.mxu0 %v181_v2  ;;  %291 = vmatpush.msra.mxu1 %v181_v2 }
  0x12   : > { %206 = vmatpush.msra.mxu0 %v180_v3  ;;  %292 = vmatpush.msra.mxu1 %v180_v3 }
  0x14   : > { %207 = vmatpush.msra.mxu0 %v179_v4  ;;  %293 = vmatpush.msra.mxu1 %v179_v4 }
  0x16   : > { %208 = vmatpush.msra.mxu0 %v178_v5  ;;  %294 = vmatpush.msra.mxu1 %v178_v5 }
  0x18   : > { %209 = vmatpush.msra.mxu0 %v177_v6  ;;  %295 = vmatpush.msra.mxu1 %v177_v6 }
  0x1a   : > { %210 = vmatpush.msra.mxu0 %v176_v7  ;;  %296 = vmatpush.msra.mxu1 %v176_v7 }
  0x1b   : > { %285 = vmatmul.msk.f32.vlgmr.msra.gmra.mxu0 %vm188_vm0, %v174_v8  ;;  %286 = vmatmul.msk.f32.vlgmr.msra.gmra.mxu1 %vm188_vm0, %v175_v9 }
  0x98   : > { %v212_v11 = vpop.f32.mrf.mxu0  ;;  %v215_v12 = vpop.f32.mrf.mxu1 }
  0x99   : > { %v213_v13 = vadd.f32 %v305_v10, %v212_v11  ;;  %v216_v14 = vadd.f32 %v305_v10, %v215_v12 }
  0x9b   : > { %218 = vst [vmem:[%s172_s13] sm:$0xff] %v213_v13 }
  0x9c   : > { %219 = vst [vmem:[%s172_s13 + $0x8] sm:$0xff] %v216_v14 }
  0x9d PF: > { %s13_s12 = sadd.s32 1, %s312_s12  }
  0x9e   : > { %p10_p4 = scmp.ge.s32.totalorder %s13_s12, 4  }
  0xa0   :  { %12 = sbr.rel (!%p10_p4) target bundleno = 1 (0x1), region = 62 }

// kernel: down_forward.7
= control target key start
LH: loop header
LB: loop body
LE: loop exit
PB: predicated region body
PF: predicated region fallthrough
CT: control target
= control target key end

     0   :  { %s523_s12 = smov 0   ;;  %s696_s0 = inlined_call_operand.vmem [shape: f32[128,32], index: 0, kind: input, shape index: {}]   ;;  %s697_s1 = inlined_call_operand.vmem [shape: f32[1,32], index: 1, kind: input, shape index: {}]   ;;  %s698_s2 = inlined_call_operand.vmem [shape: f32[1,32], index: 2, kind: input, shape index: {}]   ;;  %s699_s3 = inlined_call_operand.vmem [shape: f32[128,32], index: 3, kind: output, shape index: {}]  }
   0x1 LB: > { %s454_s13 = sadd.s32 4294967295, %s500_s12   ;;  %p458_p0 = scmp.ge.s32.totalorder %s500_s12, 1  ;;  %s500_s12 = sphi %s523_s12, %s13_s12  }
   0x2   : > { %p138_p1 = scmp.lt.s32.totalorder %s500_s12, 3 }
   0x4   : > { %p139_p2 = pnand %p458_p0, %p138_p1 }
   0x5   : > { %s459_s14 = sshll.u32 (!%p139_p2), %s454_s13, 3 }
   0x6   : > { %142 = sbr.rel (%p139_p2) target bundleno = 309 (0x135), region = 32  ;;  %p163_p3 = scmp.lt.s32.totalorder (!%p139_p2), %s459_s14, 15 }
   0xb   : > { %s703_s14 = smov (!%p163_p3, %s459_s14), 15  ;;  %vm182_vm0 = vcmask 261120   ;;  %v502_v16 = vmov 32.0  }
   0xc   : > { %s460_s15 = sshll.u32 %s703_s14, 3  ;;  %476 = vrcp.f32 %v502_v16 }
   0xd   : > { %s166_s18 = scalar_lea.vmem %s696_s0, %s460_s15  ;;  %s638_s25 = scalar_lea.vmem %s699_s3, %s460_s15 }
   0xe   : > { %v178_v0 = vld [vmem:[%s166_s18 + $0x20] sm:$0xff]  ;;  %v176_v1 = vld [vmem:[%s166_s18 + $0x10] sm:$0xff]  ;;  %v179_v6 = vld [vmem:[%s166_s18 + $0x28] sm:$0xff] }
   0xf   : > { %v174_v2 = vld [vmem:[%s166_s18] sm:$0xff]  ;;  %v195_v3 = vsel %vm182_vm0, %v178_v0, 0.0  ;;  %v189_v4 = vsel %vm182_vm0, %v176_v1, 0.0  ;;  %v177_v7 = vld [vmem:[%s166_s18 + $0x18] sm:$0xff]  ;;  %v175_v8 = vld [vmem:[%s166_s18 + $0x8] sm:$0xff]  ;;  %v198_v9 = vsel %vm182_vm0, %v179_v6, 0.0 }
  0x10   : > { %v183_v5 = vsel %vm182_vm0, %v174_v2, 0.0  ;;  %196 = vadd.xlane.f32.xlu2 %v195_v3  ;;  %190 = vadd.xlane.f32.xlu1 %v189_v4  ;;  %v192_v10 = vsel %vm182_vm0, %v177_v7, 0.0  ;;  %v186_v11 = vsel %vm182_vm0, %v175_v8, 0.0  ;;  %v181_v12 = vld [vmem:[%s166_s18 + $0x38] sm:$0xff]  ;;  %v180_v13 = vld [vmem:[%s166_s18 + $0x30] sm:$0xff] }
  0x11   : > { %184 = vadd.xlane.f32.xlu0 %v183_v5  ;;  %v204_v14 = vsel %vm182_vm0, %v181_v12, 0.0  ;;  %v201_v15 = vsel %vm182_vm0, %v180_v13, 0.0 }
  0x12   : > { %v477_v17 = vpop.eup %476 }
  0x13   : > { %v208_v18 = vmul.f32 32.0, %v477_v17  ;;  %vm212_vm1 = vweird.f32 %v477_v17 }
  0x15   : > { %v209_v19 = vsub.f32 1.0, %v208_v18 }
  0x17   : > { %v210_v20 = vmul.f32 %v477_v17, %v209_v19 }
  0x18   : > { %199 = vadd.xlane.f32.xlu2 %v198_v9  ;;  %193 = vadd.xlane.f32.xlu1 %v192_v10 }
  0x19   : > { %187 = vadd.xlane.f32.xlu0 %v186_v11  ;;  %v211_v21 = vadd.f32 %v477_v17, %v210_v20 }
  0x1b   : > { %v547_v22 = vsel %vm212_vm1, %v477_v17, %v211_v21 }
  0x20   : > { %205 = vadd.xlane.f32.xlu1 %v204_v14 }
  0x21   : > { %202 = vadd.xlane.f32.xlu0 %v201_v15 }
  0x83   : > { %v197_v23 = vpop.xlane.xlu2 %196  ;;  %v191_v24 = vpop.xlane.xlu1 %190 }
  0x84   : > { %v216_v25 = vmul.f32 %v547_v22, %v191_v24  ;;  %v185_v26 = vpop.xlane.xlu0 %184  ;;  %v218_v39 = vmul.f32 %v547_v22, %v197_v23 }
  0x85   : > { %v214_v27 = vmul.f32 %v547_v22, %v185_v26 }
  0x86   : > { %v551_v28 = vsub.f32 %v176_v1, %v216_v25  ;;  %v575_v46 = vsub.f32 %v178_v0, %v218_v39 }
  0x87   : > { %v553_v29 = vsub.f32 %v174_v2, %v214_v27 }
  0x88   : > { %v232_v30 = vmul.f32 %v551_v28, %v551_v28  ;;  %v234_v55 = vmul.f32 %v575_v46, %v575_v46 }
  0x89   : > { %v230_v31 = vmul.f32 %v553_v29, %v553_v29 }
  0x8a   : > { %v244_v32 = vsel %vm182_vm0, %v232_v30, 0.0  ;;  %v250_v58 = vsel %vm182_vm0, %v234_v55, 0.0 }
  0x8b   : > { %v200_v33 = vpop.xlane.xlu2 %199  ;;  %245 = vadd.xlane.f32.xlu1 %v244_v32  ;;  %v194_v34 = vpop.xlane.xlu1 %193  ;;  %v238_v35 = vsel %vm182_vm0, %v230_v31, 0.0 }
  0x8c   : > { %v219_v36 = vmul.f32 %v547_v22, %v200_v33  ;;  %v217_v37 = vmul.f32 %v547_v22, %v194_v34  ;;  %239 = vadd.xlane.f32.xlu2 %v238_v35  ;;  %v188_v38 = vpop.xlane.xlu0 %187 }
  0x8d   : > { %v215_v40 = vmul.f32 %v547_v22, %v188_v38 }
  0x8e   : > { %v565_v41 = vsub.f32 %v179_v6, %v219_v36  ;;  %v567_v42 = vsub.f32 %v177_v7, %v217_v37  ;;  %v615_v37 = vld [vmem:[%s697_s1] ss:$0 sm:$0xff] }
  0x8f   : > { %v569_v43 = vsub.f32 %v175_v8, %v215_v40 }
  0x90   : > { %v235_v44 = vmul.f32 %v565_v41, %v565_v41  ;;  %v233_v45 = vmul.f32 %v567_v42, %v567_v42 }
  0x91   : > { %v231_v47 = vmul.f32 %v569_v43, %v569_v43 }
  0x92   : > { %v253_v48 = vsel %vm182_vm0, %v235_v44, 0.0  ;;  %v247_v49 = vsel %vm182_vm0, %v233_v45, 0.0 }
  0x93   : > { %254 = vadd.xlane.f32.xlu1 %v253_v48  ;;  %v241_v50 = vsel %vm182_vm0, %v231_v47, 0.0  ;;  %v206_v51 = vpop.xlane.xlu1 %205  ;;  %v625_v48 = vld [vmem:[%s698_s2] ss:$0 sm:$0xff] }
  0x94   : > { %248 = vadd.xlane.f32.xlu2 %v247_v49  ;;  %242 = vadd.xlane.f32.xlu0 %v241_v50  ;;  %v203_v52 = vpop.xlane.xlu0 %202  ;;  %v221_v54 = vmul.f32 %v547_v22, %v206_v51 }
  0x95   : > { %v220_v53 = vmul.f32 %v547_v22, %v203_v52 }
  0x96   : > { %v588_v57 = vsub.f32 %v181_v12, %v221_v54 }
  0x97   : > { %v586_v56 = vsub.f32 %v180_v13, %v220_v53 }
  0x98   : > { %v237_v61 = vmul.f32 %v588_v57, %v588_v57 }
  0x99   : > { %v236_v59 = vmul.f32 %v586_v56, %v586_v56 }
  0x9a   : > { %v259_v62 = vsel %vm182_vm0, %v237_v61, 0.0 }
  0x9b   : > { %v256_v60 = vsel %vm182_vm0, %v236_v59, 0.0 }
  0x9c   : > { %251 = vadd.xlane.f32.xlu0 %v250_v58  ;;  %257 = vadd.xlane.f32.xlu2 %v256_v60 }
  0xa4   : > { %260 = vadd.xlane.f32.xlu0 %v259_v62 }
  0xfe   : > { %v246_v63 = vpop.xlane.xlu1 %245 }
  0xff   : > { %v264_v0 = vmul.f32 %v246_v63, %v547_v22  ;;  %v240_v1 = vpop.xlane.xlu2 %239 }
 0x100   : > { %v262_v2 = vmul.f32 %v240_v1, %v547_v22 }
 0x101   : > { %v272_v3 = vadd.f32 1e-06, %v264_v0 }
 0x102   : > { %v270_v4 = vadd.f32 1e-06, %v262_v2 }
 0x103   : > { %478 = vrsqrt.f32 %v272_v3  ;;  %vm304_vm2 = vweird.f32 %v272_v3 }
 0x104   : > { %480 = vrsqrt.f32 %v270_v4  ;;  %vm284_vm6 = vweird.f32 %v270_v4 }
 0x106   : > { %v255_v5 = vpop.xlane.xlu1 %254 }
 0x107   : > { %v267_v6 = vmul.f32 %v255_v5, %v547_v22  ;;  %v249_v7 = vpop.xlane.xlu2 %248  ;;  %v243_v8 = vpop.xlane.xlu0 %242 }
 0x108   : > { %v265_v9 = vmul.f32 %v249_v7, %v547_v22  ;;  %v263_v10 = vmul.f32 %v243_v8, %v547_v22 }
 0x109   : > { %v479_v11 = vpop.eup %478  ;;  %v275_v12 = vadd.f32 1e-06, %v267_v6 }
 0x10a   : > { %v481_v13 = vpop.eup %480  ;;  %v299_v14 = vmul.f32 %v479_v11, %v272_v3  ;;  %v602_v15 = vadd.f32 1e-06, %v265_v9  ;;  %v604_v16 = vadd.f32 1e-06, %v263_v10  ;;  %vm305_vm3 = vweird.f32 %v479_v11 }
 0x10b   : > { %v279_v17 = vmul.f32 %v481_v13, %v270_v4  ;;  %482 = vrsqrt.f32 %v275_v12  ;;  %vm285_vm4 = vweird.f32 %v481_v13  ;;  %vm306_vm5 = vmor %vm304_vm2, %vm305_vm3  ;;  %vm334_vm8 = vweird.f32 %v275_v12 }
 0x10c   : > { %v300_v18 = vmul.f32 %v479_v11, %v299_v14  ;;  %484 = vrsqrt.f32 %v602_v15  ;;  %vm286_vm7 = vmor %vm284_vm6, %vm285_vm4  ;;  %vm314_vm10 = vweird.f32 %v602_v15  ;;  %vm294_vm15 = vweird.f32 %v604_v16 }
 0x10d   : > { %v280_v19 = vmul.f32 %v481_v13, %v279_v17  ;;  %486 = vrsqrt.f32 %v604_v16 }
 0x10e   : > { %v301_v20 = vmul.f32 0.5, %v300_v18 }
 0x10f   : > { %v281_v21 = vmul.f32 0.5, %v280_v19  ;;  %v258_v23 = vpop.xlane.xlu2 %257  ;;  %v252_v24 = vpop.xlane.xlu0 %251 }
 0x110   : > { %v302_v25 = vsub.f32 1.5, %v301_v20  ;;  %v268_v26 = vmul.f32 %v258_v23, %v547_v22  ;;  %v266_v27 = vmul.f32 %v252_v24, %v547_v22 }
 0x111   : > { %v483_v30 = vpop.eup %482  ;;  %v282_v31 = vsub.f32 1.5, %v281_v21 }
 0x112   : > { %v485_v32 = vpop.eup %484  ;;  %v303_v33 = vmul.f32 %v479_v11, %v302_v25  ;;  %v329_v34 = vmul.f32 %v483_v30, %v275_v12  ;;  %v610_v35 = vadd.f32 1e-06, %v268_v26  ;;  %v619_v40 = vadd.f32 1e-06, %v266_v27 }
 0x113   : > { %v487_v36 = vpop.eup %486  ;;  %v283_v38 = vmul.f32 %v481_v13, %v282_v31  ;;  %v309_v39 = vmul.f32 %v485_v32, %v602_v15  ;;  %vm335_vm9 = vweird.f32 %v483_v30  ;;  %vm315_vm12 = vweird.f32 %v485_v32 }
 0x114   : > { %v307_v44 = vsel %vm306_vm5, %v479_v11, %v303_v33  ;;  %v330_v45 = vmul.f32 %v483_v30, %v329_v34  ;;  %v289_v47 = vmul.f32 %v487_v36, %v604_v16  ;;  %488 = vrsqrt.f32 %v610_v35  ;;  %vm644_vm11 = vmor %vm334_vm8, %vm335_vm9 }
 0x115   : > { %v360_v49 = vmul.f32 %v307_v44, %v551_v28  ;;  %v287_v50 = vsel %vm286_vm7, %v481_v13, %v283_v38  ;;  %v310_v51 = vmul.f32 %v485_v32, %v309_v39  ;;  %490 = vrsqrt.f32 %v619_v40  ;;  %vm316_vm14 = vmor %vm314_vm10, %vm315_vm12 }
 0x116   : > { %v358_v52 = vmul.f32 %v287_v50, %v553_v29  ;;  %v331_v53 = vmul.f32 0.5, %v330_v45  ;;  %v290_v54 = vmul.f32 %v487_v36, %v289_v47  ;;  %vm295_vm13 = vweird.f32 %v487_v36 }
 0x117   : > { %v372_v55 = vmul.f32 %v615_v37, %v360_v49  ;;  %v311_v58 = vmul.f32 0.5, %v310_v51  ;;  %v261_v59 = vpop.xlane.xlu0 %260  ;;  %vm296_vm1 = vmor %vm294_vm15, %vm295_vm13  ;;  %vm344_vm2 = vweird.f32 %v610_v35  ;;  %vm324_vm6 = vweird.f32 %v619_v40 }
 0x118   : > { %v370_v28 = vmul.f32 %v615_v37, %v358_v52  ;;  %v332_v29 = vsub.f32 1.5, %v331_v53  ;;  %v291_v60 = vmul.f32 0.5, %v290_v54  ;;  %v269_v61 = vmul.f32 %v261_v59, %v547_v22 }
 0x119   : > { %v384_v62 = vadd.f32 %v625_v48, %v372_v55  ;;  %v312_v0 = vsub.f32 1.5, %v311_v58 }
 0x11a   : > { %v382_v1 = vadd.f32 %v625_v48, %v370_v28  ;;  %v333_v2 = vmul.f32 %v483_v30, %v332_v29  ;;  %v292_v3 = vsub.f32 1.5, %v291_v60  ;;  %v277_v4 = vadd.f32 1e-06, %v269_v61  ;;  %v489_v5 = vpop.eup %488 }
 0x11b   : > { %392 = vst.msk [vmem:[%s638_s25 + $0x10] sm:$0xff] %vm182_vm0, %v384_v62  ;;  %v313_v6 = vmul.f32 %v485_v32, %v312_v0  ;;  %v339_v8 = vmul.f32 %v489_v5, %v610_v35  ;;  %v491_v9 = vpop.eup %490  ;;  %vm345_vm3 = vweird.f32 %v489_v5 }
 0x11c   : > { %390 = vst.msk [vmem:[%s638_s25] sm:$0xff] %vm182_vm0, %v382_v1  ;;  %v337_v22 = vsel %vm644_vm11, %v483_v30, %v333_v2  ;;  %v293_v7 = vmul.f32 %v487_v36, %v292_v3  ;;  %492 = vrsqrt.f32 %v277_v4  ;;  %v319_v15 = vmul.f32 %v491_v9, %v619_v40  ;;  %vm346_vm5 = vmor %vm344_vm2, %vm345_vm3 }
 0x11d   : > { %v363_v10 = vmul.f32 %v337_v22, %v565_v41  ;;  %v317_v11 = vsel %vm316_vm14, %v485_v32, %v313_v6  ;;  %v340_v14 = vmul.f32 %v489_v5, %v339_v8  ;;  %vm325_vm4 = vweird.f32 %v491_v9 }
 0x11e   : > { %v361_v12 = vmul.f32 %v317_v11, %v567_v42  ;;  %v297_v13 = vsel %vm296_vm1, %v487_v36, %v293_v7  ;;  %v320_v41 = vmul.f32 %v491_v9, %v319_v15  ;;  %vm326_vm7 = vmor %vm324_vm6, %vm325_vm4  ;;  %vm354_vm9 = vweird.f32 %v277_v4 }
 0x11f   : > { %v375_v17 = vmul.f32 %v615_v37, %v363_v10  ;;  %v359_v16 = vmul.f32 %v297_v13, %v569_v43  ;;  %v341_v19 = vmul.f32 0.5, %v340_v14 }
 0x120   : > { %v373_v18 = vmul.f32 %v615_v37, %v361_v12  ;;  %v321_v24 = vmul.f32 0.5, %v320_v41 }
 0x121   : > { %v387_v20 = vadd.f32 %v625_v48, %v375_v17  ;;  %v371_v21 = vmul.f32 %v615_v37, %v359_v16  ;;  %v342_v23 = vsub.f32 1.5, %v341_v19 }
 0x122   : > { %v385_v42 = vadd.f32 %v625_v48, %v373_v18  ;;  %v493_v25 = vpop.eup %492  ;;  %v322_v27 = vsub.f32 1.5, %v321_v24 }
 0x123   : > { %395 = vst.msk [vmem:[%s638_s25 + $0x28] sm:$0xff] %vm182_vm0, %v387_v20  ;;  %v383_v43 = vadd.f32 %v625_v48, %v371_v21  ;;  %v343_v26 = vmul.f32 %v489_v5, %v342_v23  ;;  %v349_v30 = vmul.f32 %v493_v25, %v277_v4  ;;  %vm355_vm8 = vweird.f32 %v493_v25 }
 0x124   : > { %393 = vst.msk [vmem:[%s638_s25 + $0x18] sm:$0xff] %vm182_vm0, %v385_v42  ;;  %v323_v32 = vmul.f32 %v491_v9, %v322_v27  ;;  %vm356_vm10 = vmor %vm354_vm9, %vm355_vm8 }
 0x125   : > { %391 = vst.msk [vmem:[%s638_s25 + $0x8] sm:$0xff] %vm182_vm0, %v383_v43  ;;  %v347_v31 = vsel %vm346_vm5, %v489_v5, %v343_v26  ;;  %v350_v33 = vmul.f32 %v493_v25, %v349_v30 }
 0x126   : > { %v364_v34 = vmul.f32 %v347_v31, %v586_v56  ;;  %v327_v35 = vsel %vm326_vm7, %v491_v9, %v323_v32 }
 0x127   : > { %v351_v36 = vmul.f32 0.5, %v350_v33  ;;  %v362_v39 = vmul.f32 %v327_v35, %v575_v46 }
 0x128   : > { %v376_v38 = vmul.f32 %v615_v37, %v364_v34 }
 0x129   : > { %v352_v44 = vsub.f32 1.5, %v351_v36  ;;  %v374_v47 = vmul.f32 %v615_v37, %v362_v39 }
 0x12a   : > { %v388_v45 = vadd.f32 %v625_v48, %v376_v38 }
 0x12b   : > { %v353_v49 = vmul.f32 %v493_v25, %v352_v44  ;;  %v386_v56 = vadd.f32 %v625_v48, %v374_v47 }
 0x12c   : > { %396 = vst.msk [vmem:[%s638_s25 + $0x30] sm:$0xff] %vm182_vm0, %v388_v45 }
 0x12d   : > { %v357_v40 = vsel %vm356_vm10, %v493_v25, %v353_v49  ;;  %394 = vst.msk [vmem:[%s638_s25 + $0x20] sm:$0xff] %vm182_vm0, %v386_v56 }
 0x12e   : > { %v365_v50 = vmul.f32 %v357_v40, %v588_v57 }
 0x130   : > { %v377_v46 = vmul.f32 %v615_v37, %v365_v50 }
 0x132   : > { %v389_v51 = vadd.f32 %v625_v48, %v377_v46 }
 0x134   : > { %397 = vst.msk [vmem:[%s638_s25 + $0x38] sm:$0xff] %vm182_vm0, %v389_v51 }
 0x135 PF: > { %s13_s12 = sadd.s32 1, %s500_s12  }
 0x136   : > { %p10_p4 = scmp.ge.s32.totalorder %s13_s12, 4  }
 0x138   :  { %12 = sbr.rel (!%p10_p4) target bundleno = 1 (0x1), region = 62 }

// kernel: reverse.4
= control target key start
LH: loop header
LB: loop body
LE: loop exit
PB: predicated region body
PF: predicated region fallthrough
CT: control target
= control target key end

     0   :  { %s80_s0 = inlined_call_operand.vmem [shape: f32[2,32,8,3], index: 0, kind: input, shape index: {}]   ;;  %s81_s1 = inlined_call_operand.vmem [shape: f32[2,32,8,3], index: 1, kind: output, shape index: {}]  }
   0x1   :  { %v24_v0 = vld [vmem:[%s80_s0 + $0x10] sm:$0xff]  ;;  %v25_v1 = vld [vmem:[%s80_s0 + $0x28] sm:$0xff]  ;;  %v29_v3 = vld [vmem:[%s80_s0 + $0x20] sm:$0xff] }
   0x2   :  { %v27_v2 = vld [vmem:[%s80_s0 + $0x8] sm:$0xff]  ;;  %4 = vst [vmem:[%s81_s1] sm:$0xff] %v24_v0  ;;  %v17_v4 = vld [vmem:[%s80_s0] sm:$0xff]  ;;  %v32_v5 = vld [vmem:[%s80_s0 + $0x18] sm:$0xff] }
   0x3   :  { %26 = vst [vmem:[%s81_s1 + $0x18] sm:$0xff] %v25_v1 }
   0x4   :  { %28 = vst [vmem:[%s81_s1 + $0x8] sm:$0xff] %v27_v2 }
   0x5   :  { %30 = vst [vmem:[%s81_s1 + $0x20] sm:$0xff] %v29_v3 }
   0x6   :  { %31 = vst [vmem:[%s81_s1 + $0x10] sm:$0xff] %v17_v4 }
   0x7   :  { %33 = vst [vmem:[%s81_s1 + $0x28] sm:$0xff] %v32_v5 }

// kernel: down_forward.8
= control target key start
LH: loop header
LB: loop body
LE: loop exit
PB: predicated region body
PF: predicated region fallthrough
CT: control target
= control target key end

     0   :  { %s652_s18 = smov 0   ;;  %s878_s0 = inlined_call_operand.vmem [shape: f32[128,32], index: 0, kind: input, shape index: {}]   ;;  %s879_s1 = inlined_call_operand.vmem [shape: f32[128,32], index: 1, kind: input, shape index: {}]   ;;  %s880_s2 = inlined_call_operand.vmem [shape: f32[1,32], index: 2, kind: input, shape index: {}]   ;;  %s881_s3 = inlined_call_operand.vmem [shape: f32[1,32], index: 3, kind: input, shape index: {}]   ;;  %s882_s4 = inlined_call_operand.vmem [shape: f32[1,32], index: 4, kind: input, shape index: {}]   ;;  %s883_s5 = inlined_call_operand.vmem [shape: f32[128,32], index: 5, kind: output, shape index: {}]  }
   0x1 LB: > { %s570_s19 = sadd.s32 4294967295, %s619_s18   ;;  %p574_p0 = scmp.ge.s32.totalorder %s619_s18, 1  ;;  %s619_s18 = sphi %s652_s18, %s15_s18  }
   0x2   : > { %p199_p1 = scmp.lt.s32.totalorder %s619_s18, 3 }
   0x4   : > { %p200_p2 = pnand %p574_p0, %p199_p1 }
   0x5   : > { %s575_s20 = sshll.u32 (!%p200_p2), %s570_s19, 3 }
   0x6   : > { %203 = sbr.rel (%p200_p2) target bundleno = 313 (0x139), region = 40  ;;  %p233_p3 = scmp.lt.s32.totalorder (!%p200_p2), %s575_s20, 15 }
   0xb   : > { %s887_s20 = smov (!%p233_p3, %s575_s20), 15  ;;  %vm258_vm0 = vcmask 261120   ;;  %v621_v16 = vmov 32.0  }
   0xc   : > { %s660_s21 = sshll.u32 %s887_s20, 3  ;;  %595 = vrcp.f32 %v621_v16 }
   0xd   : > { %s236_s24 = scalar_lea.vmem %s878_s0, %s660_s21  ;;  %s774_s6 = scalar_lea.vmem %s879_s1, %s660_s21 }
   0xe   : > { %v254_v0 = vld [vmem:[%s236_s24 + $0x20] sm:$0xff]  ;;  %v252_v1 = vld [vmem:[%s236_s24 + $0x10] sm:$0xff]  ;;  %v255_v6 = vld [vmem:[%s236_s24 + $0x28] sm:$0xff]  ;;  %s807_s11 = scalar_lea.vmem %s883_s5, %s660_s21 }
   0xf   : > { %v250_v2 = vld [vmem:[%s236_s24] sm:$0xff]  ;;  %v271_v3 = vsel %vm258_vm0, %v254_v0, 0.0  ;;  %v265_v4 = vsel %vm258_vm0, %v252_v1, 0.0  ;;  %v253_v7 = vld [vmem:[%s236_s24 + $0x18] sm:$0xff]  ;;  %v251_v8 = vld [vmem:[%s236_s24 + $0x8] sm:$0xff]  ;;  %v274_v9 = vsel %vm258_vm0, %v255_v6, 0.0 }
  0x10   : > { %v259_v5 = vsel %vm258_vm0, %v250_v2, 0.0  ;;  %272 = vadd.xlane.f32.xlu2 %v271_v3  ;;  %266 = vadd.xlane.f32.xlu1 %v265_v4  ;;  %v268_v10 = vsel %vm258_vm0, %v253_v7, 0.0  ;;  %v262_v11 = vsel %vm258_vm0, %v251_v8, 0.0  ;;  %v257_v12 = vld [vmem:[%s236_s24 + $0x38] sm:$0xff]  ;;  %v256_v13 = vld [vmem:[%s236_s24 + $0x30] sm:$0xff] }
  0x11   : > { %260 = vadd.xlane.f32.xlu0 %v259_v5  ;;  %v280_v14 = vsel %vm258_vm0, %v257_v12, 0.0  ;;  %v277_v15 = vsel %vm258_vm0, %v256_v13, 0.0 }
  0x12   : > { %v596_v17 = vpop.eup %595 }
  0x13   : > { %v284_v18 = vmul.f32 32.0, %v596_v17  ;;  %vm288_vm1 = vweird.f32 %v596_v17 }
  0x15   : > { %v285_v19 = vsub.f32 1.0, %v284_v18 }
  0x17   : > { %v286_v20 = vmul.f32 %v596_v17, %v285_v19 }
  0x18   : > { %275 = vadd.xlane.f32.xlu2 %v274_v9  ;;  %269 = vadd.xlane.f32.xlu1 %v268_v10 }
  0x19   : > { %263 = vadd.xlane.f32.xlu0 %v262_v11  ;;  %v287_v21 = vadd.f32 %v596_v17, %v286_v20 }
  0x1b   : > { %v674_v22 = vsel %vm288_vm1, %v596_v17, %v287_v21 }
  0x20   : > { %281 = vadd.xlane.f32.xlu1 %v280_v14 }
  0x21   : > { %278 = vadd.xlane.f32.xlu0 %v277_v15 }
  0x83   : > { %v273_v23 = vpop.xlane.xlu2 %272  ;;  %v267_v24 = vpop.xlane.xlu1 %266 }
  0x84   : > { %v292_v25 = vmul.f32 %v674_v22, %v267_v24  ;;  %v261_v26 = vpop.xlane.xlu0 %260  ;;  %v294_v39 = vmul.f32 %v674_v22, %v273_v23 }
  0x85   : > { %v290_v27 = vmul.f32 %v674_v22, %v261_v26 }
  0x86   : > { %v678_v28 = vsub.f32 %v252_v1, %v292_v25  ;;  %v702_v46 = vsub.f32 %v254_v0, %v294_v39 }
  0x87   : > { %v680_v29 = vsub.f32 %v250_v2, %v290_v27 }
  0x88   : > { %v308_v30 = vmul.f32 %v678_v28, %v678_v28  ;;  %v310_v55 = vmul.f32 %v702_v46, %v702_v46 }
  0x89   : > { %v306_v31 = vmul.f32 %v680_v29, %v680_v29 }
  0x8a   : > { %v320_v32 = vsel %vm258_vm0, %v308_v30, 0.0  ;;  %v326_v58 = vsel %vm258_vm0, %v310_v55, 0.0 }
  0x8b   : > { %v276_v33 = vpop.xlane.xlu2 %275  ;;  %321 = vadd.xlane.f32.xlu1 %v320_v32  ;;  %v270_v34 = vpop.xlane.xlu1 %269  ;;  %v314_v35 = vsel %vm258_vm0, %v306_v31, 0.0 }
  0x8c   : > { %v295_v36 = vmul.f32 %v674_v22, %v276_v33  ;;  %v293_v37 = vmul.f32 %v674_v22, %v270_v34  ;;  %315 = vadd.xlane.f32.xlu2 %v314_v35  ;;  %v264_v38 = vpop.xlane.xlu0 %263 }
  0x8d   : > { %v291_v40 = vmul.f32 %v674_v22, %v264_v38 }
  0x8e   : > { %v692_v41 = vsub.f32 %v255_v6, %v295_v36  ;;  %v694_v42 = vsub.f32 %v253_v7, %v293_v37  ;;  %v749_v37 = vld [vmem:[%s880_s2] ss:$0 sm:$0xff] }
  0x8f   : > { %v696_v43 = vsub.f32 %v251_v8, %v291_v40 }
  0x90   : > { %v311_v44 = vmul.f32 %v692_v41, %v692_v41  ;;  %v309_v45 = vmul.f32 %v694_v42, %v694_v42 }
  0x91   : > { %v307_v47 = vmul.f32 %v696_v43, %v696_v43 }
  0x92   : > { %v329_v48 = vsel %vm258_vm0, %v311_v44, 0.0  ;;  %v323_v49 = vsel %vm258_vm0, %v309_v45, 0.0 }
  0x93   : > { %330 = vadd.xlane.f32.xlu1 %v329_v48  ;;  %v317_v50 = vsel %vm258_vm0, %v307_v47, 0.0  ;;  %v282_v51 = vpop.xlane.xlu1 %281  ;;  %v762_v48 = vld [vmem:[%s881_s3] ss:$0 sm:$0xff] }
  0x94   : > { %324 = vadd.xlane.f32.xlu2 %v323_v49  ;;  %318 = vadd.xlane.f32.xlu0 %v317_v50  ;;  %v279_v52 = vpop.xlane.xlu0 %278  ;;  %v297_v54 = vmul.f32 %v674_v22, %v282_v51 }
  0x95   : > { %v296_v53 = vmul.f32 %v674_v22, %v279_v52 }
  0x96   : > { %v715_v57 = vsub.f32 %v257_v12, %v297_v54 }
  0x97   : > { %v713_v56 = vsub.f32 %v256_v13, %v296_v53 }
  0x98   : > { %v313_v61 = vmul.f32 %v715_v57, %v715_v57 }
  0x99   : > { %v312_v59 = vmul.f32 %v713_v56, %v713_v56 }
  0x9a   : > { %v335_v62 = vsel %vm258_vm0, %v313_v61, 0.0 }
  0x9b   : > { %v332_v60 = vsel %vm258_vm0, %v312_v59, 0.0 }
  0x9c   : > { %327 = vadd.xlane.f32.xlu0 %v326_v58  ;;  %333 = vadd.xlane.f32.xlu2 %v332_v60 }
  0xa4   : > { %336 = vadd.xlane.f32.xlu0 %v335_v62 }
  0xfe   : > { %v322_v63 = vpop.xlane.xlu1 %321 }
  0xff   : > { %v340_v0 = vmul.f32 %v322_v63, %v674_v22  ;;  %v316_v1 = vpop.xlane.xlu2 %315 }
 0x100   : > { %v338_v2 = vmul.f32 %v316_v1, %v674_v22 }
 0x101   : > { %v348_v3 = vadd.f32 1e-06, %v340_v0 }
 0x102   : > { %v346_v4 = vadd.f32 1e-06, %v338_v2  ;;  %v468_v2 = vld [vmem:[%s774_s6 + $0x10] sm:$0xff] }
 0x103   : > { %597 = vrsqrt.f32 %v348_v3  ;;  %vm380_vm2 = vweird.f32 %v348_v3 }
 0x104   : > { %599 = vrsqrt.f32 %v346_v4  ;;  %vm360_vm6 = vweird.f32 %v346_v4 }
 0x106   : > { %v331_v5 = vpop.xlane.xlu1 %330 }
 0x107   : > { %v343_v6 = vmul.f32 %v331_v5, %v674_v22  ;;  %v325_v7 = vpop.xlane.xlu2 %324  ;;  %v319_v8 = vpop.xlane.xlu0 %318 }
 0x108   : > { %v341_v9 = vmul.f32 %v325_v7, %v674_v22  ;;  %v339_v10 = vmul.f32 %v319_v8, %v674_v22  ;;  %v466_v7 = vld [vmem:[%s774_s6] sm:$0xff] }
 0x109   : > { %v598_v11 = vpop.eup %597  ;;  %v351_v12 = vadd.f32 1e-06, %v343_v6 }
 0x10a   : > { %v600_v13 = vpop.eup %599  ;;  %v375_v14 = vmul.f32 %v598_v11, %v348_v3  ;;  %v729_v15 = vadd.f32 1e-06, %v341_v9  ;;  %v731_v16 = vadd.f32 1e-06, %v339_v10  ;;  %vm381_vm3 = vweird.f32 %v598_v11 }
 0x10b   : > { %v355_v17 = vmul.f32 %v600_v13, %v346_v4  ;;  %601 = vrsqrt.f32 %v351_v12  ;;  %vm361_vm4 = vweird.f32 %v600_v13  ;;  %vm382_vm5 = vmor %vm380_vm2, %vm381_vm3  ;;  %vm410_vm8 = vweird.f32 %v351_v12 }
 0x10c   : > { %v376_v18 = vmul.f32 %v598_v11, %v375_v14  ;;  %603 = vrsqrt.f32 %v729_v15  ;;  %vm362_vm7 = vmor %vm360_vm6, %vm361_vm4  ;;  %vm390_vm11 = vweird.f32 %v729_v15  ;;  %vm370_vm14 = vweird.f32 %v731_v16 }
 0x10d   : > { %v356_v19 = vmul.f32 %v600_v13, %v355_v17  ;;  %605 = vrsqrt.f32 %v731_v16 }
 0x10e   : > { %v377_v20 = vmul.f32 0.5, %v376_v18 }
 0x10f   : > { %v357_v21 = vmul.f32 0.5, %v356_v19  ;;  %v334_v23 = vpop.xlane.xlu2 %333  ;;  %v328_v24 = vpop.xlane.xlu0 %327 }
 0x110   : > { %v378_v25 = vsub.f32 1.5, %v377_v20  ;;  %v344_v26 = vmul.f32 %v334_v23, %v674_v22  ;;  %v342_v27 = vmul.f32 %v328_v24, %v674_v22 }
 0x111   : > { %v737_v30 = vpop.eup %601  ;;  %v358_v31 = vsub.f32 1.5, %v357_v21 }
 0x112   : > { %v739_v32 = vpop.eup %603  ;;  %v379_v33 = vmul.f32 %v598_v11, %v378_v25  ;;  %v405_v34 = vmul.f32 %v737_v30, %v351_v12  ;;  %v742_v35 = vadd.f32 1e-06, %v344_v26  ;;  %v754_v40 = vadd.f32 1e-06, %v342_v27 }
 0x113   : > { %v744_v36 = vpop.eup %605  ;;  %v359_v38 = vmul.f32 %v600_v13, %v358_v31  ;;  %v385_v39 = vmul.f32 %v739_v32, %v729_v15  ;;  %vm411_vm9 = vweird.f32 %v737_v30  ;;  %vm391_vm12 = vweird.f32 %v739_v32  ;;  %v471_v31 = vld [vmem:[%s774_s6 + $0x28] sm:$0xff] }
 0x114   : > { %v383_v44 = vsel %vm382_vm5, %v598_v11, %v379_v33  ;;  %v406_v45 = vmul.f32 %v737_v30, %v405_v34  ;;  %v365_v47 = vmul.f32 %v744_v36, %v731_v16  ;;  %607 = vrsqrt.f32 %v742_v35  ;;  %vm787_vm10 = vmor %vm410_vm8, %vm411_vm9  ;;  %v469_v34 = vld [vmem:[%s774_s6 + $0x18] sm:$0xff] }
 0x115   : > { %v436_v49 = vmul.f32 %v383_v44, %v678_v28  ;;  %v363_v50 = vsel %vm362_vm7, %v600_v13, %v359_v38  ;;  %v386_v51 = vmul.f32 %v739_v32, %v385_v39  ;;  %v779_v28 = vld [vmem:[%s882_s4] ss:$0 sm:$0xff]  ;;  %609 = vrsqrt.f32 %v754_v40  ;;  %vm392_vm15 = vmor %vm390_vm11, %vm391_vm12  ;;  %v467_v44 = vld [vmem:[%s774_s6 + $0x8] sm:$0xff] }
 0x116   : > { %v434_v52 = vmul.f32 %v363_v50, %v680_v29  ;;  %v407_v53 = vmul.f32 0.5, %v406_v45  ;;  %v366_v54 = vmul.f32 %v744_v36, %v365_v47  ;;  %vm371_vm13 = vweird.f32 %v744_v36 }
 0x117   : > { %v448_v55 = vmul.f32 %v749_v37, %v436_v49  ;;  %v387_v58 = vmul.f32 0.5, %v386_v51  ;;  %v337_v29 = vpop.xlane.xlu0 %336  ;;  %vm372_vm1 = vmor %vm370_vm14, %vm371_vm13  ;;  %vm420_vm2 = vweird.f32 %v742_v35  ;;  %vm400_vm6 = vweird.f32 %v754_v40 }
 0x118   : > { %v446_v59 = vmul.f32 %v749_v37, %v434_v52  ;;  %v408_v60 = vsub.f32 1.5, %v407_v53  ;;  %v367_v61 = vmul.f32 0.5, %v366_v54  ;;  %v345_v62 = vmul.f32 %v337_v29, %v674_v22 }
 0x119   : > { %v460_v63 = vadd.f32 %v762_v48, %v448_v55  ;;  %v388_v1 = vsub.f32 1.5, %v387_v58 }
 0x11a   : > { %v458_v3 = vadd.f32 %v762_v48, %v446_v59  ;;  %v409_v4 = vmul.f32 %v737_v30, %v408_v60  ;;  %v368_v5 = vsub.f32 1.5, %v367_v61  ;;  %v608_v22 = vpop.eup %607  ;;  %v801_v9 = vadd.f32 1e-06, %v345_v62 }
 0x11b   : > { %v480_v6 = vmul.f32 %v779_v28, %v460_v63  ;;  %v389_v8 = vmul.f32 %v739_v32, %v388_v1  ;;  %v415_v13 = vmul.f32 %v608_v22, %v742_v35  ;;  %v610_v14 = vpop.eup %609  ;;  %vm421_vm3 = vweird.f32 %v608_v22 }
 0x11c   : > { %v478_v10 = vmul.f32 %v779_v28, %v458_v3  ;;  %v413_v11 = vsel %vm787_vm10, %v737_v30, %v409_v4  ;;  %v369_v12 = vmul.f32 %v744_v36, %v368_v5  ;;  %611 = vrsqrt.f32 %v801_v9  ;;  %vm422_vm4 = vmor %vm420_vm2, %vm421_vm3  ;;  %v470_v4 = vld [vmem:[%s774_s6 + $0x20] sm:$0xff] }
 0x11d   : > { %v488_v16 = vadd.f32 %v480_v6, %v468_v2  ;;  %v439_v17 = vmul.f32 %v413_v11, %v692_v41  ;;  %v393_v18 = vsel %vm392_vm15, %v739_v32, %v389_v8  ;;  %v416_v21 = vmul.f32 %v608_v22, %v415_v13  ;;  %v473_v11 = vld [vmem:[%s774_s6 + $0x38] sm:$0xff] }
 0x11e   : > { %v486_v19 = vadd.f32 %v478_v10, %v466_v7  ;;  %v437_v20 = vmul.f32 %v393_v18, %v694_v42  ;;  %v373_v15 = vsel %vm372_vm1, %v744_v36, %v369_v12  ;;  %v395_v41 = vmul.f32 %v610_v14, %v754_v40 }
 0x11f   : > { %496 = vst.msk [vmem:[%s807_s11 + $0x10] sm:$0xff] %vm258_vm0, %v488_v16  ;;  %v451_v23 = vmul.f32 %v749_v37, %v439_v17  ;;  %v435_v24 = vmul.f32 %v373_v15, %v696_v43  ;;  %v417_v26 = vmul.f32 0.5, %v416_v21  ;;  %vm401_vm5 = vweird.f32 %v610_v14 }
 0x120   : > { %494 = vst.msk [vmem:[%s807_s11] sm:$0xff] %vm258_vm0, %v486_v19  ;;  %v449_v25 = vmul.f32 %v749_v37, %v437_v20  ;;  %v396_v30 = vmul.f32 %v610_v14, %v395_v41  ;;  %vm402_vm7 = vmor %vm400_vm6, %vm401_vm5  ;;  %vm430_vm9 = vweird.f32 %v801_v9 }
 0x121   : > { %v463_v42 = vadd.f32 %v762_v48, %v451_v23  ;;  %v447_v27 = vmul.f32 %v749_v37, %v435_v24  ;;  %v418_v33 = vsub.f32 1.5, %v417_v26 }
 0x122   : > { %v461_v32 = vadd.f32 %v762_v48, %v449_v25  ;;  %v397_v38 = vmul.f32 0.5, %v396_v30  ;;  %v612_v35 = vpop.eup %611 }
 0x123   : > { %v483_v43 = vmul.f32 %v779_v28, %v463_v42  ;;  %v459_v36 = vadd.f32 %v762_v48, %v447_v27  ;;  %v419_v45 = vmul.f32 %v608_v22, %v418_v33  ;;  %v425_v58 = vmul.f32 %v612_v35, %v801_v9 }
 0x124   : > { %v481_v39 = vmul.f32 %v779_v28, %v461_v32  ;;  %v398_v50 = vsub.f32 1.5, %v397_v38  ;;  %vm431_vm8 = vweird.f32 %v612_v35 }
 0x125   : > { %v491_v47 = vadd.f32 %v483_v43, %v471_v31  ;;  %v479_v49 = vmul.f32 %v779_v28, %v459_v36  ;;  %v423_v52 = vsel %vm422_vm4, %v608_v22, %v419_v45  ;;  %v426_v60 = vmul.f32 %v612_v35, %v425_v58  ;;  %vm432_vm10 = vmor %vm430_vm9, %vm431_vm8 }
 0x126   : > { %v489_v51 = vadd.f32 %v481_v39, %v469_v34  ;;  %v440_v54 = vmul.f32 %v423_v52, %v713_v56  ;;  %v399_v55 = vmul.f32 %v610_v14, %v398_v50  ;;  %v472_v56 = vld [vmem:[%s774_s6 + $0x30] sm:$0xff] }
 0x127   : > { %499 = vst.msk [vmem:[%s807_s11 + $0x28] sm:$0xff] %vm258_vm0, %v491_v47  ;;  %v487_v53 = vadd.f32 %v479_v49, %v467_v44  ;;  %v427_v62 = vmul.f32 0.5, %v426_v60 }
 0x128   : > { %497 = vst.msk [vmem:[%s807_s11 + $0x18] sm:$0xff] %vm258_vm0, %v489_v51  ;;  %v452_v29 = vmul.f32 %v749_v37, %v440_v54  ;;  %v403_v59 = vsel %vm402_vm7, %v610_v14, %v399_v55 }
 0x129   : > { %495 = vst.msk [vmem:[%s807_s11 + $0x8] sm:$0xff] %vm258_vm0, %v487_v53  ;;  %v438_v40 = vmul.f32 %v403_v59, %v702_v46  ;;  %v428_v1 = vsub.f32 1.5, %v427_v62 }
 0x12a   : > { %v464_v61 = vadd.f32 %v762_v48, %v452_v29 }
 0x12b   : > { %v450_v63 = vmul.f32 %v749_v37, %v438_v40  ;;  %v429_v5 = vmul.f32 %v612_v35, %v428_v1 }
 0x12c   : > { %v484_v0 = vmul.f32 %v779_v28, %v464_v61 }
 0x12d   : > { %v462_v2 = vadd.f32 %v762_v48, %v450_v63  ;;  %v433_v22 = vsel %vm432_vm10, %v612_v35, %v429_v5 }
 0x12e   : > { %v492_v3 = vadd.f32 %v484_v0, %v472_v56  ;;  %v441_v7 = vmul.f32 %v433_v22, %v715_v57 }
 0x12f   : > { %v482_v46 = vmul.f32 %v779_v28, %v462_v2 }
 0x130   : > { %500 = vst.msk [vmem:[%s807_s11 + $0x30] sm:$0xff] %vm258_vm0, %v492_v3  ;;  %v453_v8 = vmul.f32 %v749_v37, %v441_v7 }
 0x131   : > { %v490_v6 = vadd.f32 %v482_v46, %v470_v4 }
 0x132   : > { %v465_v10 = vadd.f32 %v762_v48, %v453_v8 }
 0x133   : > { %498 = vst.msk [vmem:[%s807_s11 + $0x20] sm:$0xff] %vm258_vm0, %v490_v6 }
 0x134   : > { %v485_v12 = vmul.f32 %v779_v28, %v465_v10 }
 0x136   : > { %v493_v13 = vadd.f32 %v485_v12, %v473_v11 }
 0x138   : > { %501 = vst.msk [vmem:[%s807_s11 + $0x38] sm:$0xff] %vm258_vm0, %v493_v13 }
 0x139 PF: > { %s15_s18 = sadd.s32 1, %s619_s18  }
 0x13a   : > { %p12_p4 = scmp.ge.s32.totalorder %s15_s18, 4  }
 0x13c   :  { %14 = sbr.rel (!%p12_p4) target bundleno = 1 (0x1), region = 73 }

// kernel: down_forward.11
= control target key start
LH: loop header
LB: loop body
LE: loop exit
PB: predicated region body
PF: predicated region fallthrough
CT: control target
= control target key end

     0   :  { %8 = vsyncpa [#allocation3], 0  ;;  %s874_s0 = inlined_call_operand.vmem [shape: f32[128,32], index: 0, kind: input, shape index: {}]   ;;  %s875_s1 = inlined_call_operand.vmem [shape: f32[1,32], index: 1, kind: input, shape index: {}]   ;;  %s876_s2 = inlined_call_operand.vmem [shape: f32[1,32], index: 2, kind: input, shape index: {}]   ;;  %s877_s3 = inlined_call_operand.hbm [shape: f32[128,32], index: 3, kind: output, shape index: {}]  }
   0x1   :  { %10 = vsyncpa [#allocation3 + $0x1], 0  ;;  %s636_s12 = smov 0   ;;  %s638_s13 = smov 0  }
   0x2   :  { %s640_s14 = smov 0   ;;  %s642_s15 = smov 0  }
   0x3 LB: > { %s657_s16 = sadd.s32 4294967295, %s611_s15   ;;  %s474_s17 = sadd.s32 4294967294, %s611_s15   ;;  %s611_s15 = sphi %s642_s15, %s885_s15   ;;  %s607_s14 = sphi %s640_s14, %s884_s14   ;;  %s603_s13 = sphi %s638_s13, %s883_s13   ;;  %s599_s12 = sphi %s636_s12, %s882_s12  }
   0x4   : > { %s661_s18 = sadd.s32 1, %s611_s15   ;;  %s91_s19 = sadd.s32 1, %s607_s14 }
   0x5   : > { %s88_s20 = ssub.s32 %s611_s15, %s661_s18  ;;  %p101_p0 = scmp.ne.s32.totalorder %s607_s14, %s603_s13 }
   0x6   : > { %p89_p1 = scmp.eq.s32.totalorder %s88_s20, 0  ;;  %p102_p2 = scmp.eq.s32.totalorder %s657_s16, 1 }
   0x7   : > { %p107_p3 = scmp.ne.s32.totalorder %s603_s13, %s599_s12  ;;  %p108_p4 = scmp.eq.s32.totalorder %s474_s17, 1 }
   0x8   : > { %s672_s21 = scalar_select %p89_p1, %s607_s14, %s91_s19  }
   0x9   : > { %p674_p5 = por %p102_p2, %p101_p0  ;;  %p678_p6 = por %p108_p4, %p107_p3 }
   0xa   : > { %p477_p7 = scmp.ge.s32.totalorder %s611_s15, 1  ;;  %p141_p8 = scmp.lt.s32.totalorder %s611_s15, 3 }
   0xc   : > { %p142_p9 = pnand %p477_p7, %p141_p8 }
   0xd   : > { %s479_s24 = sshll.u32 (!%p142_p9), %s657_s16, 3  ;;  %s162_s29 = sand.u32 (!%p142_p9), 1, %s603_s13  }
   0xe   : > { %145 = sbr.rel (%p142_p9) target bundleno = 320 (0x140), region = 32  ;;  %p166_p10 = scmp.lt.s32.totalorder (!%p142_p9), %s479_s24, 15 }
   0xf   : > { %s478_s7 = sshll.u32 (!%p142_p9), %s162_s29, 6  ;;  %s486_s9 = sshll.u32 (!%p142_p9), %s657_s16, 6 }
  0x10   : > { %s794_s8 = scalar_lea.vmem (!%p142_p9), [#allocation2], %s478_s7  ;;  %s408_s17 = scalar_lea.hbm (!%p142_p9), %s877_s3, %s486_s9 }
  0x11   : > { %s409_s16 = sshll.u32 (!%p142_p9), %s794_s8, 4  ;;  %s411_s19 = sshll.u32 (!%p142_p9), %s408_s17, 4  ;;  %s410_s16 = int_to_ptr.vmem [resolvable:$true] %s409_s16  ;;  %s412_s19 = int_to_ptr.hbm [resolvable:$true] %s411_s19 }
  0x12   : > { %s397_s20 = scalar_lea.sflag (!%p142_p9), [#allocation3], %s162_s29 }
  0x13   : > { %s887_s24 = smov (!%p166_p10, %s479_s24), 15  ;;  %vm180_vm0 = vcmask 261120   ;;  %v613_v16 = vmov 32.0  }
  0x14   : > { %s480_s25 = sshll.u32 %s887_s24, 3  ;;  %531 = vrcp.f32 %v613_v16  ;;  %s563_s24 = sshra.s32 %s412_s19, 4  ;;  %s564_s24 = int_to_ptr.hbm [resolvable:$true] %s563_s24 }
  0x15   : > { %s169_s28 = scalar_lea.vmem %s874_s0, %s480_s25  ;;  %s565_s25 = scalar_lea.hbm %s564_s24, 64 }
  0x16   : > { %v176_v0 = vld [vmem:[%s169_s28 + $0x20] sm:$0xff]  ;;  %v174_v1 = vld [vmem:[%s169_s28 + $0x10] sm:$0xff]  ;;  %v177_v6 = vld [vmem:[%s169_s28 + $0x28] sm:$0xff]  ;;  %p566_p11 = scmp.ne.s32.totalorder %s564_s24, %s565_s25  ;;  %p570_p0 = scmp.lt.s32.totalorder %s564_s24, %s877_s3 }
  0x17   : > { %v172_v2 = vld [vmem:[%s169_s28] sm:$0xff]  ;;  %v193_v3 = vsel %vm180_vm0, %v176_v0, 0.0  ;;  %v187_v4 = vsel %vm180_vm0, %v174_v1, 0.0  ;;  %v175_v7 = vld [vmem:[%s169_s28 + $0x18] sm:$0xff]  ;;  %v173_v8 = vld [vmem:[%s169_s28 + $0x8] sm:$0xff]  ;;  %v196_v9 = vsel %vm180_vm0, %v177_v6, 0.0 }
  0x18   : > { %v181_v5 = vsel %vm180_vm0, %v172_v2, 0.0  ;;  %194 = vadd.xlane.f32.xlu2 %v193_v3  ;;  %188 = vadd.xlane.f32.xlu1 %v187_v4  ;;  %v190_v10 = vsel %vm180_vm0, %v175_v7, 0.0  ;;  %v184_v11 = vsel %vm180_vm0, %v173_v8, 0.0  ;;  %v179_v12 = vld [vmem:[%s169_s28 + $0x38] sm:$0xff]  ;;  %v178_v13 = vld [vmem:[%s169_s28 + $0x30] sm:$0xff]  ;;  %p567_p12 = pnand %p566_p11, %p674_p5  ;;  %s569_s28 = scalar_lea.hbm %s877_s3, 128 }
  0x19   : > { %182 = vadd.xlane.f32.xlu0 %v181_v5  ;;  %v202_v14 = vsel %vm180_vm0, %v179_v12, 0.0  ;;  %v199_v15 = vsel %vm180_vm0, %v178_v13, 0.0  ;;  %p571_p1 = scmp.lt.s32.totalorder %s569_s28, %s565_s25 }
  0x1a   : > { %v532_v17 = vpop.eup %531  ;;  %p568_p13 = pneg %p567_p12 }
  0x1b   : > { %v206_v18 = vmul.f32 32.0, %v532_v17  ;;  %vm210_vm1 = vweird.f32 %v532_v17  ;;  %p572_p2 = por %p571_p1, %p570_p0 }
  0x1d   : > { %v207_v19 = vsub.f32 1.0, %v206_v18  ;;  %p573_p3 = pnand %p572_p2, %p568_p13 }
  0x1f   : > { %v208_v20 = vmul.f32 %v532_v17, %v207_v19 }
  0x20   : > { %197 = vadd.xlane.f32.xlu2 %v196_v9  ;;  %191 = vadd.xlane.f32.xlu1 %v190_v10 }
  0x21   : > { %185 = vadd.xlane.f32.xlu0 %v184_v11  ;;  %v209_v21 = vadd.f32 %v532_v17, %v208_v20 }
  0x23   : > { %v696_v22 = vsel %vm210_vm1, %v532_v17, %v209_v21 }
  0x28   : > { %203 = vadd.xlane.f32.xlu1 %v202_v14 }
  0x29   : > { %200 = vadd.xlane.f32.xlu0 %v199_v15 }
  0x8b   : > { %v195_v23 = vpop.xlane.xlu2 %194  ;;  %v189_v24 = vpop.xlane.xlu1 %188 }
  0x8c   : > { %v214_v25 = vmul.f32 %v696_v22, %v189_v24  ;;  %v183_v26 = vpop.xlane.xlu0 %182  ;;  %v216_v39 = vmul.f32 %v696_v22, %v195_v23 }
  0x8d   : > { %v212_v27 = vmul.f32 %v696_v22, %v183_v26 }
  0x8e   : > { %v700_v28 = vsub.f32 %v174_v1, %v214_v25  ;;  %v724_v46 = vsub.f32 %v176_v0, %v216_v39 }
  0x8f   : > { %v702_v29 = vsub.f32 %v172_v2, %v212_v27 }
  0x90   : > { %v230_v30 = vmul.f32 %v700_v28, %v700_v28  ;;  %v232_v55 = vmul.f32 %v724_v46, %v724_v46 }
  0x91   : > { %v228_v31 = vmul.f32 %v702_v29, %v702_v29 }
  0x92   : > { %v242_v32 = vsel %vm180_vm0, %v230_v30, 0.0  ;;  %v248_v58 = vsel %vm180_vm0, %v232_v55, 0.0 }
  0x93   : > { %v198_v33 = vpop.xlane.xlu2 %197  ;;  %243 = vadd.xlane.f32.xlu1 %v242_v32  ;;  %v192_v34 = vpop.xlane.xlu1 %191  ;;  %v236_v35 = vsel %vm180_vm0, %v228_v31, 0.0 }
  0x94   : > { %v217_v36 = vmul.f32 %v696_v22, %v198_v33  ;;  %v215_v37 = vmul.f32 %v696_v22, %v192_v34  ;;  %237 = vadd.xlane.f32.xlu2 %v236_v35  ;;  %v186_v38 = vpop.xlane.xlu0 %185 }
  0x95   : > { %v213_v40 = vmul.f32 %v696_v22, %v186_v38 }
  0x96   : > { %v714_v41 = vsub.f32 %v177_v6, %v217_v36  ;;  %v716_v42 = vsub.f32 %v175_v7, %v215_v37  ;;  %v765_v37 = vld [vmem:[%s875_s1] ss:$0 sm:$0xff] }
  0x97   : > { %v718_v43 = vsub.f32 %v173_v8, %v213_v40 }
  0x98   : > { %v233_v44 = vmul.f32 %v714_v41, %v714_v41  ;;  %v231_v45 = vmul.f32 %v716_v42, %v716_v42 }
  0x99   : > { %v229_v47 = vmul.f32 %v718_v43, %v718_v43 }
  0x9a   : > { %v251_v48 = vsel %vm180_vm0, %v233_v44, 0.0  ;;  %v245_v49 = vsel %vm180_vm0, %v231_v45, 0.0 }
  0x9b   : > { %252 = vadd.xlane.f32.xlu1 %v251_v48  ;;  %v239_v50 = vsel %vm180_vm0, %v229_v47, 0.0  ;;  %v204_v51 = vpop.xlane.xlu1 %203  ;;  %v775_v48 = vld [vmem:[%s876_s2] ss:$0 sm:$0xff] }
  0x9c   : > { %246 = vadd.xlane.f32.xlu2 %v245_v49  ;;  %240 = vadd.xlane.f32.xlu0 %v239_v50  ;;  %v201_v52 = vpop.xlane.xlu0 %200  ;;  %v219_v54 = vmul.f32 %v696_v22, %v204_v51 }
  0x9d   : > { %v218_v53 = vmul.f32 %v696_v22, %v201_v52 }
  0x9e   : > { %v737_v57 = vsub.f32 %v179_v12, %v219_v54 }
  0x9f   : > { %v735_v56 = vsub.f32 %v178_v13, %v218_v53 }
  0xa0   : > { %v235_v61 = vmul.f32 %v737_v57, %v737_v57 }
  0xa1   : > { %v234_v59 = vmul.f32 %v735_v56, %v735_v56 }
  0xa2   : > { %v257_v62 = vsel %vm180_vm0, %v235_v61, 0.0 }
  0xa3   : > { %v254_v60 = vsel %vm180_vm0, %v234_v59, 0.0 }
  0xa4   : > { %249 = vadd.xlane.f32.xlu0 %v248_v58  ;;  %255 = vadd.xlane.f32.xlu2 %v254_v60 }
  0xac   : > { %258 = vadd.xlane.f32.xlu0 %v257_v62 }
 0x106   : > { %v244_v63 = vpop.xlane.xlu1 %243 }
 0x107   : > { %v262_v0 = vmul.f32 %v244_v63, %v696_v22  ;;  %v238_v1 = vpop.xlane.xlu2 %237 }
 0x108   : > { %v260_v2 = vmul.f32 %v238_v1, %v696_v22 }
 0x109   : > { %v270_v3 = vadd.f32 1e-06, %v262_v0 }
 0x10a   : > { %v268_v4 = vadd.f32 1e-06, %v260_v2 }
 0x10b   : > { %533 = vrsqrt.f32 %v270_v3  ;;  %vm302_vm2 = vweird.f32 %v270_v3 }
 0x10c   : > { %535 = vrsqrt.f32 %v268_v4  ;;  %vm282_vm6 = vweird.f32 %v268_v4 }
 0x10e   : > { %v253_v5 = vpop.xlane.xlu1 %252 }
 0x10f   : > { %v265_v6 = vmul.f32 %v253_v5, %v696_v22  ;;  %v247_v7 = vpop.xlane.xlu2 %246  ;;  %v241_v8 = vpop.xlane.xlu0 %240 }
 0x110   : > { %v263_v9 = vmul.f32 %v247_v7, %v696_v22  ;;  %v261_v10 = vmul.f32 %v241_v8, %v696_v22 }
 0x111   : > { %v534_v11 = vpop.eup %533  ;;  %v273_v12 = vadd.f32 1e-06, %v265_v6 }
 0x112   : > { %v536_v13 = vpop.eup %535  ;;  %v297_v14 = vmul.f32 %v534_v11, %v270_v3  ;;  %v751_v15 = vadd.f32 1e-06, %v263_v9  ;;  %v753_v16 = vadd.f32 1e-06, %v261_v10  ;;  %vm303_vm3 = vweird.f32 %v534_v11 }
 0x113   : > { %v277_v17 = vmul.f32 %v536_v13, %v268_v4  ;;  %537 = vrsqrt.f32 %v273_v12  ;;  %vm283_vm4 = vweird.f32 %v536_v13  ;;  %vm304_vm5 = vmor %vm302_vm2, %vm303_vm3  ;;  %vm332_vm8 = vweird.f32 %v273_v12 }
 0x114   : > { %v298_v18 = vmul.f32 %v534_v11, %v297_v14  ;;  %539 = vrsqrt.f32 %v751_v15  ;;  %vm284_vm7 = vmor %vm282_vm6, %vm283_vm4  ;;  %vm312_vm10 = vweird.f32 %v751_v15  ;;  %vm292_vm15 = vweird.f32 %v753_v16 }
 0x115   : > { %v278_v19 = vmul.f32 %v536_v13, %v277_v17  ;;  %541 = vrsqrt.f32 %v753_v16 }
 0x116   : > { %v299_v20 = vmul.f32 0.5, %v298_v18 }
 0x117   : > { %v279_v21 = vmul.f32 0.5, %v278_v19  ;;  %v256_v23 = vpop.xlane.xlu2 %255  ;;  %v250_v24 = vpop.xlane.xlu0 %249 }
 0x118   : > { %v300_v25 = vsub.f32 1.5, %v299_v20  ;;  %v266_v26 = vmul.f32 %v256_v23, %v696_v22  ;;  %v264_v27 = vmul.f32 %v250_v24, %v696_v22 }
 0x119   : > { %v538_v30 = vpop.eup %537  ;;  %v280_v31 = vsub.f32 1.5, %v279_v21 }
 0x11a   : > { %v540_v32 = vpop.eup %539  ;;  %v301_v33 = vmul.f32 %v534_v11, %v300_v25  ;;  %v327_v34 = vmul.f32 %v538_v30, %v273_v12  ;;  %v760_v35 = vadd.f32 1e-06, %v266_v26  ;;  %v769_v40 = vadd.f32 1e-06, %v264_v27 }
 0x11b   : > { %v542_v36 = vpop.eup %541  ;;  %v281_v38 = vmul.f32 %v536_v13, %v280_v31  ;;  %v307_v39 = vmul.f32 %v540_v32, %v751_v15  ;;  %vm333_vm9 = vweird.f32 %v538_v30  ;;  %vm313_vm12 = vweird.f32 %v540_v32 }
 0x11c   : > { %v305_v44 = vsel %vm304_vm5, %v534_v11, %v301_v33  ;;  %v328_v45 = vmul.f32 %v538_v30, %v327_v34  ;;  %v287_v47 = vmul.f32 %v542_v36, %v753_v16  ;;  %543 = vrsqrt.f32 %v760_v35  ;;  %vm789_vm11 = vmor %vm332_vm8, %vm333_vm9 }
 0x11d   : > { %v358_v49 = vmul.f32 %v305_v44, %v700_v28  ;;  %v285_v50 = vsel %vm284_vm7, %v536_v13, %v281_v38  ;;  %v308_v51 = vmul.f32 %v540_v32, %v307_v39  ;;  %545 = vrsqrt.f32 %v769_v40  ;;  %vm314_vm14 = vmor %vm312_vm10, %vm313_vm12 }
 0x11e   : > { %v356_v52 = vmul.f32 %v285_v50, %v702_v29  ;;  %v329_v53 = vmul.f32 0.5, %v328_v45  ;;  %v288_v54 = vmul.f32 %v542_v36, %v287_v47  ;;  %vm293_vm13 = vweird.f32 %v542_v36 }
 0x11f   : > { %v370_v55 = vmul.f32 %v765_v37, %v358_v49  ;;  %v309_v58 = vmul.f32 0.5, %v308_v51  ;;  %v259_v59 = vpop.xlane.xlu0 %258  ;;  %vm294_vm1 = vmor %vm292_vm15, %vm293_vm13  ;;  %vm342_vm2 = vweird.f32 %v760_v35  ;;  %vm322_vm6 = vweird.f32 %v769_v40 }
 0x120   : > { %v368_v60 = vmul.f32 %v765_v37, %v356_v52  ;;  %v330_v28 = vsub.f32 1.5, %v329_v53  ;;  %v289_v61 = vmul.f32 0.5, %v288_v54  ;;  %v267_v62 = vmul.f32 %v259_v59, %v696_v22 }
 0x121   : > { %v382_v63 = vadd.f32 %v775_v48, %v370_v55  ;;  %v310_v0 = vsub.f32 1.5, %v309_v58 }
 0x122   : > { %v380_v1 = vadd.f32 %v775_v48, %v368_v60  ;;  %v331_v2 = vmul.f32 %v538_v30, %v330_v28  ;;  %v290_v3 = vsub.f32 1.5, %v289_v61  ;;  %v275_v4 = vadd.f32 1e-06, %v267_v62  ;;  %v544_v5 = vpop.eup %543 }
 0x123   : > { %390 = vst.msk [vmem:[%s794_s8 + $0x10] sm:$0xff] %vm180_vm0, %v382_v63  ;;  %v311_v22 = vmul.f32 %v540_v32, %v310_v0  ;;  %v337_v8 = vmul.f32 %v544_v5, %v760_v35  ;;  %v546_v9 = vpop.eup %545  ;;  %vm343_vm3 = vweird.f32 %v544_v5 }
 0x124   : > { %388 = vst.msk [vmem:[%s794_s8] sm:$0xff] %vm180_vm0, %v380_v1  ;;  %v335_v6 = vsel %vm789_vm11, %v538_v30, %v331_v2  ;;  %v291_v7 = vmul.f32 %v542_v36, %v290_v3  ;;  %547 = vrsqrt.f32 %v275_v4  ;;  %v317_v15 = vmul.f32 %v546_v9, %v769_v40  ;;  %vm344_vm5 = vmor %vm342_vm2, %vm343_vm3 }
 0x125   : > { %v361_v10 = vmul.f32 %v335_v6, %v714_v41  ;;  %v315_v11 = vsel %vm314_vm14, %v540_v32, %v311_v22  ;;  %v338_v14 = vmul.f32 %v544_v5, %v337_v8  ;;  %vm323_vm4 = vweird.f32 %v546_v9 }
 0x126   : > { %v359_v12 = vmul.f32 %v315_v11, %v716_v42  ;;  %v295_v13 = vsel %vm294_vm1, %v542_v36, %v291_v7  ;;  %v318_v41 = vmul.f32 %v546_v9, %v317_v15  ;;  %vm324_vm7 = vmor %vm322_vm6, %vm323_vm4  ;;  %vm352_vm9 = vweird.f32 %v275_v4 }
 0x127   : > { %v373_v17 = vmul.f32 %v765_v37, %v361_v10  ;;  %v357_v16 = vmul.f32 %v295_v13, %v718_v43  ;;  %v339_v19 = vmul.f32 0.5, %v338_v14 }
 0x128   : > { %v371_v18 = vmul.f32 %v765_v37, %v359_v12  ;;  %v319_v24 = vmul.f32 0.5, %v318_v41 }
 0x129   : > { %v385_v20 = vadd.f32 %v775_v48, %v373_v17  ;;  %v369_v21 = vmul.f32 %v765_v37, %v357_v16  ;;  %v340_v23 = vsub.f32 1.5, %v339_v19 }
 0x12a   : > { %v383_v42 = vadd.f32 %v775_v48, %v371_v18  ;;  %v548_v25 = vpop.eup %547  ;;  %v320_v27 = vsub.f32 1.5, %v319_v24 }
 0x12b   : > { %393 = vst.msk [vmem:[%s794_s8 + $0x28] sm:$0xff] %vm180_vm0, %v385_v20  ;;  %v381_v43 = vadd.f32 %v775_v48, %v369_v21  ;;  %v341_v26 = vmul.f32 %v544_v5, %v340_v23  ;;  %v347_v30 = vmul.f32 %v548_v25, %v275_v4  ;;  %vm353_vm8 = vweird.f32 %v548_v25 }
 0x12c   : > { %391 = vst.msk [vmem:[%s794_s8 + $0x18] sm:$0xff] %vm180_vm0, %v383_v42  ;;  %v321_v32 = vmul.f32 %v546_v9, %v320_v27  ;;  %vm354_vm10 = vmor %vm352_vm9, %vm353_vm8 }
 0x12d   : > { %389 = vst.msk [vmem:[%s794_s8 + $0x8] sm:$0xff] %vm180_vm0, %v381_v43  ;;  %v345_v31 = vsel %vm344_vm5, %v544_v5, %v341_v26  ;;  %v348_v33 = vmul.f32 %v548_v25, %v347_v30 }
 0x12e   : > { %v362_v34 = vmul.f32 %v345_v31, %v735_v56  ;;  %v325_v35 = vsel %vm324_vm7, %v546_v9, %v321_v32 }
 0x12f   : > { %v349_v36 = vmul.f32 0.5, %v348_v33  ;;  %v360_v39 = vmul.f32 %v325_v35, %v724_v46 }
 0x130   : > { %v374_v38 = vmul.f32 %v765_v37, %v362_v34 }
 0x131   : > { %v350_v44 = vsub.f32 1.5, %v349_v36  ;;  %v372_v47 = vmul.f32 %v765_v37, %v360_v39 }
 0x132   : > { %v386_v45 = vadd.f32 %v775_v48, %v374_v38 }
 0x133   : > { %v351_v40 = vmul.f32 %v548_v25, %v350_v44  ;;  %v384_v56 = vadd.f32 %v775_v48, %v372_v47 }
 0x134   : > { %394 = vst.msk [vmem:[%s794_s8 + $0x30] sm:$0xff] %vm180_vm0, %v386_v45 }
 0x135   : > { %v355_v46 = vsel %vm354_vm10, %v548_v25, %v351_v40  ;;  %392 = vst.msk [vmem:[%s794_s8 + $0x20] sm:$0xff] %vm180_vm0, %v384_v56 }
 0x136   : > { %v363_v49 = vmul.f32 %v355_v46, %v737_v57 }
 0x138   : > { %v375_v50 = vmul.f32 %v765_v37, %v363_v49 }
 0x13a   : > { %v387_v51 = vadd.f32 %v775_v48, %v375_v50 }
 0x13c   : > { %395 = vst.msk [vmem:[%s794_s8 + $0x38] sm:$0xff] %vm180_vm0, %v387_v51 }
 0x13d   : > { %576 = shalt.err (!%p573_p3)
}
 0x13e   : > { %s614_s29 = smov 128   ;;  %s615_s5 = smov 8  }
 0x13f   : > { %487 = dma.vmem_to_hbm [thread:$0]  (%p674_p5), %s410_s16, 1024, %s412_s19, %s397_s20, %s614_s29, %s614_s29, %s615_s5  }
 0x140 PF: > { %p493_p4 = scmp.ge.s32.totalorder %s611_s15, 2  ;;  %s426_s6 = sand.u32 1, %s599_s12  }
 0x141   : > { %s427_s7 = scalar_lea.sflag [#allocation3], %s426_s6 }
 0x142   : > { %p490_p7 = pnand %p493_p4, %p678_p6 }
 0x144   : > { %p491_p8 = pneg %p490_p7 }
 0x146   : > { %594 = dma.done.wait (%p491_p8), %s427_s7, 1024  }
 0x147   : > { %596 = vsyncadd (%p491_p8), %s427_s7, 4294966272  ;;  %p13_p9 = scmp.ge.s32.totalorder %s661_s18, 4   ;;  %s882_s12 = smov %s603_s13 }
 0x148   : > { %s883_s13 = smov %s607_s14  ;;  %s884_s14 = smov %s672_s21 }
 0x149   : > { %s885_s15 = smov %s661_s18  ;;  %15 = sbr.rel (!%p13_p9) target bundleno = 3 (0x3), region = 67 }
 0x14e   :  { %433 = vsyncpa [#allocation3], 1 }
 0x14f   :  { %435 = vsyncpa [#allocation3 + $0x1], 1 }

</bundles_post_ra>
